<compile_context>
chip_gen: v5e
topology: v5e:2x2
jax: 0.10.0
libtpu: 0.0.40
codegen_flags: <defaults>
</compile_context>

<pallas_src>
import jax
import jax.numpy as jnp
from jax.experimental import pallas as pl
from jax.experimental.pallas import tpu as pltpu

# ----------------------- model hyper-parameters (small) -----------------------
BATCH = 8          # batch
SEQ = 8            # caption / sequence length
EMBED_DIM = 32     # logical embedding_dim (PyTorch default is 300)
EPAD = 128         # embedding dim zero-padded to lane width
HIDDEN = 128       # en_hidden_size == de_hidden_size
VOCAB = 128        # vocab_size
NUM_LAYERS = 2
TEACHER_FORCE_RATIO = 0.5

assert EPAD == HIDDEN, "stacked-weight layout assumes padded embed dim == hidden"


# ------------------------------ shared cell math -------------------------------
def _lstm_stack_step(x, h_sc, c_sc, w_ref, b_ref):
    """One timestep through the stacked LSTM (PyTorch gate order i,f,g,o).

    Updates h_sc/c_sc scratch refs in place; returns the top-layer hidden state.
    Weights are the merged [W_ih; W_hh] stacks, shape (L, EPAD+H, 4H).
    """
    inp = x
    for l in range(NUM_LAYERS):
        xh = jnp.concatenate([inp, h_sc[l]], axis=1)                 # (B, 2*H)
        gates = (jnp.dot(xh, w_ref[l], preferred_element_type=jnp.float32)
                 + b_ref[l])                                         # (B, 4H)
        i = jax.nn.sigmoid(gates[:, 0 * HIDDEN:1 * HIDDEN])
        f = jax.nn.sigmoid(gates[:, 1 * HIDDEN:2 * HIDDEN])
        g = jnp.tanh(gates[:, 2 * HIDDEN:3 * HIDDEN])
        o = jax.nn.sigmoid(gates[:, 3 * HIDDEN:4 * HIDDEN])
        c_new = f * c_sc[l] + i * g
        h_new = o * jnp.tanh(c_new)
        c_sc[l] = c_new
        h_sc[l] = h_new
        inp = h_new   # inter-layer nn.Dropout is identity in eval mode
    return inp


# ------------------------------- encoder kernel --------------------------------
def encoder_kernel(emb_ref, w_ref, b_ref, c_out_ref, h_sc, c_sc):
    t = pl.program_id(0)

    @pl.when(t == 0)
    def _init():
        h_sc[...] = jnp.zeros_like(h_sc)
        c_sc[...] = jnp.zeros_like(c_sc)

    _lstm_stack_step(emb_ref[0], h_sc, c_sc, w_ref, b_ref)

    @pl.when(t == pl.num_programs(0) - 1)
    def _finalize():
        c_out_ref[...] = c_sc[...]


def encoder_forward(emb_tbe, w_stack, b_stack):
    """emb_tbe: (T, B, EPAD) -> final cell states (num_layers, B, H)."""
    T, B, _ = emb_tbe.shape
    grid_spec = pltpu.PrefetchScalarGridSpec(
        num_scalar_prefetch=0,
        grid=(T,),
        in_specs=[
            pl.BlockSpec((1, B, EPAD), lambda t: (t, 0, 0)),          # per-step embed
            pl.BlockSpec(w_stack.shape, lambda t: (0, 0, 0)),         # resident weights
            pl.BlockSpec(b_stack.shape, lambda t: (0, 0, 0)),         # resident bias
        ],
        out_specs=pl.BlockSpec((NUM_LAYERS, B, HIDDEN), lambda t: (0, 0, 0)),
        scratch_shapes=[
            pltpu.VMEM((NUM_LAYERS, B, HIDDEN), jnp.float32),         # h state
            pltpu.VMEM((NUM_LAYERS, B, HIDDEN), jnp.float32),         # c state
        ],
    )
    return pl.pallas_call(
        encoder_kernel,
        out_shape=jax.ShapeDtypeStruct((NUM_LAYERS, B, HIDDEN), jnp.float32),
        grid_spec=grid_spec,
        compiler_params=pltpu.CompilerParams(dimension_semantics=("arbitrary",)),
    )(emb_tbe, w_stack, b_stack)


# ------------------------------- decoder kernel --------------------------------
def decoder_kernel(tf_ref, cell_ref, cap_ref, w_ref, b_ref, vw_ref, vb_ref, tab_ref,
                   out_ref, h_sc, c_sc, x_sc):
    s = pl.program_id(0)   # grid step s produces output timestep t = s + 1

    @pl.when(s == 0)
    def _init():
        # hidden = cell.detach().clone(); decoderLSTM starts from (hidden, cell)
        h_sc[...] = cell_ref[...]
        c_sc[...] = cell_ref[...]

    # Input selection: step 0 always uses caption[:, 0]; later steps use the
    # teacher-forced caption[:, s] when tf[s] != 0, otherwise keep the previous
    # step's predicted-token embedding already sitting in x_sc.
    @pl.when(jnp.logical_or(s == 0, tf_ref[s] != 0))
    def _teacher_force():
        x_sc[...] = cap_ref[0]

    top_h = _lstm_stack_step(x_sc[...], h_sc, c_sc, w_ref, b_ref)

    logits = (jnp.dot(top_h, vw_ref[...], preferred_element_type=jnp.float32)
              + vb_ref[...])                                          # (B, V)
    out_ref[0] = logits

    # In-kernel argmax (first-max tie break, matches torch/jnp argmax) and
    # embedding lookup as a one-hot MXU matmul against the resident table.
    col = jax.lax.broadcasted_iota(jnp.int32, logits.shape, 1)
    mx = jnp.max(logits, axis=1, keepdims=True)
    idx = jnp.min(jnp.where(logits == mx, col, VOCAB), axis=1, keepdims=True)
    onehot = (col == idx).astype(jnp.float32)                         # (B, V)
    x_sc[...] = jnp.dot(onehot, tab_ref[...], preferred_element_type=jnp.float32)


def decoder_forward(tf_flags, cell, cap_tbe, w_stack, b_stack, vw_t, vb, embed_pad):
    """Returns decoder logits for timesteps 1..T-1, shape (T-1, B, V)."""
    T, B, _ = cap_tbe.shape
    steps = T - 1
    grid_spec = pltpu.PrefetchScalarGridSpec(
        num_scalar_prefetch=1,                     # tf_flags -> SMEM
        grid=(steps,),
        in_specs=[
            pl.BlockSpec((NUM_LAYERS, B, HIDDEN), lambda s, tf: (0, 0, 0)),  # enc cell
            pl.BlockSpec((1, B, EPAD), lambda s, tf: (s, 0, 0)),             # caption emb
            pl.BlockSpec(w_stack.shape, lambda s, tf: (0, 0, 0)),            # LSTM weights
            pl.BlockSpec(b_stack.shape, lambda s, tf: (0, 0, 0)),            # LSTM bias
            pl.BlockSpec(vw_t.shape, lambda s, tf: (0, 0)),                  # vocab W^T
            pl.BlockSpec(vb.shape, lambda s, tf: (0, 0)),                    # vocab bias
            pl.BlockSpec(embed_pad.shape, lambda s, tf: (0, 0)),             # embed table
        ],
        out_specs=pl.BlockSpec((1, B, VOCAB), lambda s, tf: (s, 0, 0)),
        scratch_shapes=[
            pltpu.VMEM((NUM_LAYERS, B, HIDDEN), jnp.float32),   # h state
            pltpu.VMEM((NUM_LAYERS, B, HIDDEN), jnp.float32),   # c state
            pltpu.VMEM((B, EPAD), jnp.float32),                 # current lstm input
        ],
    )
    return pl.pallas_call(
        decoder_kernel,
        out_shape=jax.ShapeDtypeStruct((steps, B, VOCAB), jnp.float32),
        grid_spec=grid_spec,
        compiler_params=pltpu.CompilerParams(dimension_semantics=("arbitrary",)),
    )(tf_flags, cell, cap_tbe, w_stack, b_stack, vw_t, vb, embed_pad)


# ------------------------------ model composition ------------------------------
def encoder_decoder_forward(tokens, params, tf_key):
    B, T = tokens.shape
    embed_pad = params['embed']                           # (VOCAB, EPAD)
    # Shared nn.Embedding for encoder input and decoder captions (one gather).
    emb = jnp.take(embed_pad, tokens, axis=0)             # (B, T, EPAD)
    emb_tbe = jnp.transpose(emb, (1, 0, 2))               # (T, B, EPAD)
    # TODO(synk): nn.Dropout on embeddings / between LSTM layers omitted (eval-mode identity).

    cell = encoder_forward(emb_tbe, params['en_w'], params['en_b'])

    # One coin flip per timestep for the whole batch (mirrors random.random()).
    tf_flags = (jax.random.uniform(tf_key, (T,)) < TEACHER_FORCE_RATIO).astype(jnp.int32)

    dec = decoder_forward(tf_flags, cell, emb_tbe, params['de_w'], params['de_b'],
                          params['vocab_w_t'], params['vocab_b'], embed_pad)
    dec = jnp.transpose(dec, (1, 0, 2))                   # (B, T-1, V)

    # outputs[:, 0, 1] = 1, rest of the t=0 row is zero (start token convention).
    first = jnp.zeros((B, 1, VOCAB), jnp.float32).at[:, 0, 1].set(1.0)
    return jnp.concatenate([first, dec], axis=1)          # (B, T, V)


# --------------------------- deterministic parameters ---------------------------
def init_params(key):
    keys = iter(jax.random.split(key, 64))

    def unif(shape, bound):
        return jax.random.uniform(next(keys), shape, jnp.float32, -bound, bound)

    # Shared nn.Embedding(vocab, embed_dim, padding_idx=0), zero-padded to EPAD lanes.
    embed = jax.random.normal(next(keys), (VOCAB, EMBED_DIM), jnp.float32)
    embed = embed.at[0].set(0.0)
    embed_pad = jnp.zeros((VOCAB, EPAD), jnp.float32).at[:, :EMBED_DIM].set(embed)

    bound = 1.0 / (HIDDEN ** 0.5)

    def lstm_stack():
        ws, bs = [], []
        for l in range(NUM_LAYERS):
            in_dim = EMBED_DIM if l == 0 else HIDDEN
            w_ih = unif((4 * HIDDEN, in_dim), bound)     # PyTorch layout (4H, in)
            w_hh = unif((4 * HIDDEN, HIDDEN), bound)     # (4H, H)
            b_ih = unif((4 * HIDDEN,), bound)
            b_hh = unif((4 * HIDDEN,), bound)
            # pre-transpose + zero-pad input rows to EPAD, then merge [W_ih; W_hh]
            w_ih_t = jnp.zeros((EPAD, 4 * HIDDEN), jnp.float32).at[:in_dim, :].set(w_ih.T)
            ws.append(jnp.concatenate([w_ih_t, w_hh.T], axis=0))   # (EPAD+H, 4H)
            bs.append((b_ih + b_hh)[None, :])                      # (1, 4H)
        return jnp.stack(ws), jnp.stack(bs)              # (L, 256, 512), (L, 1, 512)

    en_w, en_b = lstm_stack()
    de_w, de_b = lstm_stack()

    # nn.Linear(hidden_size, vocab_size)
    vocab_w = unif((VOCAB, HIDDEN), bound)
    vocab_b = unif((VOCAB,), bound)

    return {
        'embed': embed_pad,
        'en_w': en_w, 'en_b': en_b,
        'de_w': de_w, 'de_b': de_b,
        'vocab_w_t': vocab_w.T,          # (H, V)
        'vocab_b': vocab_b[None, :],     # (1, V)
    }


# ------------------------------------- main -------------------------------------
if __name__ == "__main__":
    root = jax.random.PRNGKey(0)
    k_params, k_tokens, k_tf = jax.random.split(root, 3)

    params = init_params(k_params)
    tokens = jax.random.randint(k_tokens, (BATCH, SEQ), 0, VOCAB, dtype=jnp.int32)

    fwd = jax.jit(encoder_decoder_forward)
    out = jax.block_until_ready(fwd(tokens, params, k_tf))

    assert out.shape == (BATCH, SEQ, VOCAB), out.shape
    assert out.dtype == jnp.float32
    assert bool(jnp.all(out[:, 0, 1] == 1.0))
    assert bool(jnp.all(out[:, 0, 2:] == 0.0))
    assert bool(jnp.all(jnp.isfinite(out)))
    print("KERNEL_OK")
</pallas_src>

<mosaic_0001>
module attributes {stable_mosaic.version = 11 : i64} {
  func.func @encoder_kernel(%arg0: i32, %arg1: memref<1x8x128xf32, #tpu.memory_space<vmem>>, %arg2: memref<2x256x512xf32, #tpu.memory_space<vmem>>, %arg3: memref<2x1x512xf32, #tpu.memory_space<vmem>>, %arg4: memref<2x8x128xf32, #tpu.memory_space<vmem>>, %arg5: memref<2x8x128xf32, #tpu.memory_space<vmem>>, %arg6: memref<2x8x128xf32, #tpu.memory_space<vmem>>) attributes {dimension_semantics = [#tpu.dimension_semantics<arbitrary>], iteration_bounds = array<i64: 8>, scalar_prefetch = 0 : i64, scratch_operands = 2 : i64, tpu.core_type = #tpu.core_type<tc>, window_params = [{transform_indices = @transform_0, window_bounds = array<i64: 1, 8, 128>}, {pipeline_mode = #tpu.pipeline_mode<synchronous>, transform_indices = @transform_1, window_bounds = array<i64: 2, 256, 512>}, {pipeline_mode = #tpu.pipeline_mode<synchronous>, transform_indices = @transform_2, window_bounds = array<i64: 2, 1, 512>}, {pipeline_mode = #tpu.pipeline_mode<synchronous>, transform_indices = @transform_3, window_bounds = array<i64: 2, 8, 128>}]} {
    %c0_i32 = arith.constant 0 : i32
    %0 = arith.cmpi eq, %arg0, %c0_i32 : i32
    %1 = arith.extui %0 : i1 to i32
    %c0_i32_0 = arith.constant 0 : i32
    %2 = arith.cmpi ne, %1, %c0_i32_0 : i32
    scf.if %2 {
      %cst_46 = arith.constant 0.000000e+00 : f32
      %94 = vector.broadcast %cst_46 : f32 to vector<2x8x128xf32>
      %c0_47 = arith.constant 0 : index
      %c0_48 = arith.constant 0 : index
      %c0_49 = arith.constant 0 : index
      %95 = vector.load %arg5[%c0_47, %c0_48, %c0_49] : memref<2x8x128xf32, #tpu.memory_space<vmem>>, vector<2x8x128xf32>
      tpu.vector_store %arg5[%c0_47, %c0_48, %c0_49], %94 {strides = array<i32>} : memref<2x8x128xf32, #tpu.memory_space<vmem>>, vector<2x8x128xf32>,
      %cst_50 = arith.constant 0.000000e+00 : f32
      %96 = vector.broadcast %cst_50 : f32 to vector<2x8x128xf32>
      %c0_51 = arith.constant 0 : index
      %c0_52 = arith.constant 0 : index
      %c0_53 = arith.constant 0 : index
      %97 = vector.load %arg6[%c0_51, %c0_52, %c0_53] : memref<2x8x128xf32, #tpu.memory_space<vmem>>, vector<2x8x128xf32>
      tpu.vector_store %arg6[%c0_51, %c0_52, %c0_53], %96 {strides = array<i32>} : memref<2x8x128xf32, #tpu.memory_space<vmem>>, vector<2x8x128xf32>,
    } else {
    }
    %c0 = arith.constant 0 : index
    %c0_1 = arith.constant 0 : index
    %c0_2 = arith.constant 0 : index
    %3 = vector.load %arg1[%c0, %c0_1, %c0_2] : memref<1x8x128xf32, #tpu.memory_space<vmem>>, vector<1x8x128xf32>
    %4 = vector.shape_cast %3 : vector<1x8x128xf32> to vector<8x128xf32>
    %c0_3 = arith.constant 0 : index
    %c0_4 = arith.constant 0 : index
    %c0_5 = arith.constant 0 : index
    %5 = vector.load %arg5[%c0_3, %c0_4, %c0_5] : memref<2x8x128xf32, #tpu.memory_space<vmem>>, vector<1x8x128xf32>
    %6 = vector.shape_cast %5 : vector<1x8x128xf32> to vector<8x128xf32>
    %7 = tpu.concatenate %4, %6 in 1 : vector<8x128xf32>, vector<8x128xf32> -> vector<8x256xf32>
    %c0_6 = arith.constant 0 : index
    %c0_7 = arith.constant 0 : index
    %c0_8 = arith.constant 0 : index
    %8 = vector.load %arg2[%c0_6, %c0_7, %c0_8] : memref<2x256x512xf32, #tpu.memory_space<vmem>>, vector<1x256x512xf32>
    %9 = vector.shape_cast %8 : vector<1x256x512xf32> to vector<256x512xf32>
    %cst = arith.constant dense<0.000000e+00> : vector<8x512xf32>
    %10 = tpu.matmul %7, %9, %cst {dimension_numbers = #tpu.dot_dimension_numbers<[1], [0], [0], [1], [0, 0, 1, 1], [], []>} : vector<8x256xf32>, vector<256x512xf32>, vector<8x512xf32> -> vector<8x512xf32>
    %c0_9 = arith.constant 0 : index
    %c0_10 = arith.constant 0 : index
    %c0_11 = arith.constant 0 : index
    %11 = vector.load %arg3[%c0_9, %c0_10, %c0_11] : memref<2x1x512xf32, #tpu.memory_space<vmem>>, vector<1x1x512xf32>
    %12 = vector.shape_cast %11 : vector<1x1x512xf32> to vector<1x512xf32>
    %13 = vector.broadcast %12 : vector<1x512xf32> to vector<8x512xf32>
    %14 = arith.addf %10, %13 : vector<8x512xf32>
    %15 = vector.extract_strided_slice %14 {offsets = [0, 0], sizes = [8, 128], strides = [1, 1]} : vector<8x512xf32> to vector<8x128xf32>
    %16 = arith.negf %15 : vector<8x128xf32>
    %17 = math.exp %16 : vector<8x128xf32>
    %cst_12 = arith.constant 1.000000e+00 : f32
    %18 = vector.broadcast %cst_12 : f32 to vector<8x128xf32>
    %19 = arith.addf %18, %17 : vector<8x128xf32>
    %20 = arith.divf %18, %19 : vector<8x128xf32>
    %21 = vector.extract_strided_slice %14 {offsets = [0, 128], sizes = [8, 128], strides = [1, 1]} : vector<8x512xf32> to vector<8x128xf32>
    %22 = arith.negf %21 : vector<8x128xf32>
    %23 = math.exp %22 : vector<8x128xf32>
    %cst_13 = arith.constant 1.000000e+00 : f32
    %24 = vector.broadcast %cst_13 : f32 to vector<8x128xf32>
    %25 = arith.addf %24, %23 : vector<8x128xf32>
    %26 = arith.divf %24, %25 : vector<8x128xf32>
    %27 = vector.extract_strided_slice %14 {offsets = [0, 256], sizes = [8, 128], strides = [1, 1]} : vector<8x512xf32> to vector<8x128xf32>
    %28 = math.tanh %27 : vector<8x128xf32>
    %29 = vector.extract_strided_slice %14 {offsets = [0, 384], sizes = [8, 128], strides = [1, 1]} : vector<8x512xf32> to vector<8x128xf32>
    %30 = arith.negf %29 : vector<8x128xf32>
    %31 = math.exp %30 : vector<8x128xf32>
    %cst_14 = arith.constant 1.000000e+00 : f32
    %32 = vector.broadcast %cst_14 : f32 to vector<8x128xf32>
    %33 = arith.addf %32, %31 : vector<8x128xf32>
    %34 = arith.divf %32, %33 : vector<8x128xf32>
    %c0_15 = arith.constant 0 : index
    %c0_16 = arith.constant 0 : index
    %c0_17 = arith.constant 0 : index
    %35 = vector.load %arg6[%c0_15, %c0_16, %c0_17] : memref<2x8x128xf32, #tpu.memory_space<vmem>>, vector<1x8x128xf32>
    %36 = vector.shape_cast %35 : vector<1x8x128xf32> to vector<8x128xf32>
    %37 = arith.mulf %26, %36 : vector<8x128xf32>
    %38 = arith.mulf %20, %28 : vector<8x128xf32>
    %39 = arith.addf %37, %38 : vector<8x128xf32>
    %40 = math.tanh %39 : vector<8x128xf32>
    %41 = arith.mulf %34, %40 : vector<8x128xf32>
    %c0_18 = arith.constant 0 : index
    %c0_19 = arith.constant 0 : index
    %c0_20 = arith.constant 0 : index
    %42 = vector.load %arg6[%c0_18, %c0_19, %c0_20] : memref<2x8x128xf32, #tpu.memory_space<vmem>>, vector<1x8x128xf32>
    %43 = vector.shape_cast %42 : vector<1x8x128xf32> to vector<8x128xf32>
    %44 = vector.shape_cast %39 : vector<8x128xf32> to vector<1x8x128xf32>
    tpu.vector_store %arg6[%c0_18, %c0_19, %c0_20], %44 {strides = array<i32>} : memref<2x8x128xf32, #tpu.memory_space<vmem>>, vector<1x8x128xf32>,
    %c0_21 = arith.constant 0 : index
    %c0_22 = arith.constant 0 : index
    %c0_23 = arith.constant 0 : index
    %45 = vector.load %arg5[%c0_21, %c0_22, %c0_23] : memref<2x8x128xf32, #tpu.memory_space<vmem>>, vector<1x8x128xf32>
    %46 = vector.shape_cast %45 : vector<1x8x128xf32> to vector<8x128xf32>
    %47 = vector.shape_cast %41 : vector<8x128xf32> to vector<1x8x128xf32>
    tpu.vector_store %arg5[%c0_21, %c0_22, %c0_23], %47 {strides = array<i32>} : memref<2x8x128xf32, #tpu.memory_space<vmem>>, vector<1x8x128xf32>,
    %c1 = arith.constant 1 : index
    %c0_24 = arith.constant 0 : index
    %c0_25 = arith.constant 0 : index
    %48 = vector.load %arg5[%c1, %c0_24, %c0_25] : memref<2x8x128xf32, #tpu.memory_space<vmem>>, vector<1x8x128xf32>
    %49 = vector.shape_cast %48 : vector<1x8x128xf32> to vector<8x128xf32>
    %50 = tpu.concatenate %41, %49 in 1 : vector<8x128xf32>, vector<8x128xf32> -> vector<8x256xf32>
    %c1_26 = arith.constant 1 : index
    %c0_27 = arith.constant 0 : index
    %c0_28 = arith.constant 0 : index
    %51 = vector.load %arg2[%c1_26, %c0_27, %c0_28] : memref<2x256x512xf32, #tpu.memory_space<vmem>>, vector<1x256x512xf32>
    %52 = vector.shape_cast %51 : vector<1x256x512xf32> to vector<256x512xf32>
    %cst_29 = arith.constant dense<0.000000e+00> : vector<8x512xf32>
    %53 = tpu.matmul %50, %52, %cst_29 {dimension_numbers = #tpu.dot_dimension_numbers<[1], [0], [0], [1], [0, 0, 1, 1], [], []>} : vector<8x256xf32>, vector<256x512xf32>, vector<8x512xf32> -> vector<8x512xf32>
    %c1_30 = arith.constant 1 : index
    %c0_31 = arith.constant 0 : index
    %c0_32 = arith.constant 0 : index
    %54 = vector.load %arg3[%c1_30, %c0_31, %c0_32] : memref<2x1x512xf32, #tpu.memory_space<vmem>>, vector<1x1x512xf32>
    %55 = vector.shape_cast %54 : vector<1x1x512xf32> to vector<1x512xf32>
    %56 = vector.broadcast %55 : vector<1x512xf32> to vector<8x512xf32>
    %57 = arith.addf %53, %56 : vector<8x512xf32>
    %58 = vector.extract_strided_slice %57 {offsets = [0, 0], sizes = [8, 128], strides = [1, 1]} : vector<8x512xf32> to vector<8x128xf32>
    %59 = arith.negf %58 : vector<8x128xf32>
    %60 = math.exp %59 : vector<8x128xf32>
    %cst_33 = arith.constant 1.000000e+00 : f32
    %61 = vector.broadcast %cst_33 : f32 to vector<8x128xf32>
    %62 = arith.addf %61, %60 : vector<8x128xf32>
    %63 = arith.divf %61, %62 : vector<8x128xf32>
    %64 = vector.extract_strided_slice %57 {offsets = [0, 128], sizes = [8, 128], strides = [1, 1]} : vector<8x512xf32> to vector<8x128xf32>
    %65 = arith.negf %64 : vector<8x128xf32>
    %66 = math.exp %65 : vector<8x128xf32>
    %cst_34 = arith.constant 1.000000e+00 : f32
    %67 = vector.broadcast %cst_34 : f32 to vector<8x128xf32>
    %68 = arith.addf %67, %66 : vector<8x128xf32>
    %69 = arith.divf %67, %68 : vector<8x128xf32>
    %70 = vector.extract_strided_slice %57 {offsets = [0, 256], sizes = [8, 128], strides = [1, 1]} : vector<8x512xf32> to vector<8x128xf32>
    %71 = math.tanh %70 : vector<8x128xf32>
    %72 = vector.extract_strided_slice %57 {offsets = [0, 384], sizes = [8, 128], strides = [1, 1]} : vector<8x512xf32> to vector<8x128xf32>
    %73 = arith.negf %72 : vector<8x128xf32>
    %74 = math.exp %73 : vector<8x128xf32>
    %cst_35 = arith.constant 1.000000e+00 : f32
    %75 = vector.broadcast %cst_35 : f32 to vector<8x128xf32>
    %76 = arith.addf %75, %74 : vector<8x128xf32>
    %77 = arith.divf %75, %76 : vector<8x128xf32>
    %c1_36 = arith.constant 1 : index
    %c0_37 = arith.constant 0 : index
    %c0_38 = arith.constant 0 : index
    %78 = vector.load %arg6[%c1_36, %c0_37, %c0_38] : memref<2x8x128xf32, #tpu.memory_space<vmem>>, vector<1x8x128xf32>
    %79 = vector.shape_cast %78 : vector<1x8x128xf32> to vector<8x128xf32>
    %80 = arith.mulf %69, %79 : vector<8x128xf32>
    %81 = arith.mulf %63, %71 : vector<8x128xf32>
    %82 = arith.addf %80, %81 : vector<8x128xf32>
    %83 = math.tanh %82 : vector<8x128xf32>
    %84 = arith.mulf %77, %83 : vector<8x128xf32>
    %c1_39 = arith.constant 1 : index
    %c0_40 = arith.constant 0 : index
    %c0_41 = arith.constant 0 : index
    %85 = vector.load %arg6[%c1_39, %c0_40, %c0_41] : memref<2x8x128xf32, #tpu.memory_space<vmem>>, vector<1x8x128xf32>
    %86 = vector.shape_cast %85 : vector<1x8x128xf32> to vector<8x128xf32>
    %87 = vector.shape_cast %82 : vector<8x128xf32> to vector<1x8x128xf32>
    tpu.vector_store %arg6[%c1_39, %c0_40, %c0_41], %87 {strides = array<i32>} : memref<2x8x128xf32, #tpu.memory_space<vmem>>, vector<1x8x128xf32>,
    %c1_42 = arith.constant 1 : index
    %c0_43 = arith.constant 0 : index
    %c0_44 = arith.constant 0 : index
    %88 = vector.load %arg5[%c1_42, %c0_43, %c0_44] : memref<2x8x128xf32, #tpu.memory_space<vmem>>, vector<1x8x128xf32>
    %89 = vector.shape_cast %88 : vector<1x8x128xf32> to vector<8x128xf32>
    %90 = vector.shape_cast %84 : vector<8x128xf32> to vector<1x8x128xf32>
    tpu.vector_store %arg5[%c1_42, %c0_43, %c0_44], %90 {strides = array<i32>} : memref<2x8x128xf32, #tpu.memory_space<vmem>>, vector<1x8x128xf32>,
    %c7_i32 = arith.constant 7 : i32
    %91 = arith.cmpi eq, %arg0, %c7_i32 : i32
    %92 = arith.extui %91 : i1 to i32
    %c0_i32_45 = arith.constant 0 : i32
    %93 = arith.cmpi ne, %92, %c0_i32_45 : i32
    scf.if %93 {
      %c0_46 = arith.constant 0 : index
      %c0_47 = arith.constant 0 : index
      %c0_48 = arith.constant 0 : index
      %94 = vector.load %arg6[%c0_46, %c0_47, %c0_48] : memref<2x8x128xf32, #tpu.memory_space<vmem>>, vector<2x8x128xf32>
      %c0_49 = arith.constant 0 : index
      %c0_50 = arith.constant 0 : index
      %c0_51 = arith.constant 0 : index
      %95 = vector.load %arg4[%c0_49, %c0_50, %c0_51] : memref<2x8x128xf32, #tpu.memory_space<vmem>>, vector<2x8x128xf32>
      tpu.vector_store %arg4[%c0_49, %c0_50, %c0_51], %94 {strides = array<i32>} : memref<2x8x128xf32, #tpu.memory_space<vmem>>, vector<2x8x128xf32>,
    } else {
    }
    return
  }
  func.func @transform_0(%arg0: i32) -> (i32, i32, i32) {
    %c0_i32 = arith.constant 0 : i32
    %c0_i32_0 = arith.constant 0 : i32
    %c0_i32_1 = arith.constant 0 : i32
    return %arg0, %c0_i32, %c0_i32_0 : i32, i32, i32
  }
  func.func @transform_1(%arg0: i32) -> (i32, i32, i32) {
    %c0_i32 = arith.constant 0 : i32
    %c0_i32_0 = arith.constant 0 : i32
    %c0_i32_1 = arith.constant 0 : i32
    %c0_i32_2 = arith.constant 0 : i32
    return %c0_i32, %c0_i32_0, %c0_i32_1 : i32, i32, i32
  }
  func.func @transform_2(%arg0: i32) -> (i32, i32, i32) {
    %c0_i32 = arith.constant 0 : i32
    %c0_i32_0 = arith.constant 0 : i32
    %c0_i32_1 = arith.constant 0 : i32
    %c0_i32_2 = arith.constant 0 : i32
    return %c0_i32, %c0_i32_0, %c0_i32_1 : i32, i32, i32
  }
  func.func @transform_3(%arg0: i32) -> (i32, i32, i32) {
    %c0_i32 = arith.constant 0 : i32
    %c0_i32_0 = arith.constant 0 : i32
    %c0_i32_1 = arith.constant 0 : i32
    %c0_i32_2 = arith.constant 0 : i32
    return %c0_i32, %c0_i32_0, %c0_i32_1 : i32, i32, i32
  }
}

module attributes {stable_mosaic.version = 11 : i64} {
  func.func @decoder_kernel(%arg0: i32, %arg1: memref<8xi32, #tpu.memory_space<smem>>, %arg2: memref<2x8x128xf32, #tpu.memory_space<vmem>>, %arg3: memref<1x8x128xf32, #tpu.memory_space<vmem>>, %arg4: memref<2x256x512xf32, #tpu.memory_space<vmem>>, %arg5: memref<2x1x512xf32, #tpu.memory_space<vmem>>, %arg6: memref<128x128xf32, #tpu.memory_space<vmem>>, %arg7: memref<1x128xf32, #tpu.memory_space<vmem>>, %arg8: memref<128x128xf32, #tpu.memory_space<vmem>>, %arg9: memref<1x8x128xf32, #tpu.memory_space<vmem>>, %arg10: memref<2x8x128xf32, #tpu.memory_space<vmem>>, %arg11: memref<2x8x128xf32, #tpu.memory_space<vmem>>, %arg12: memref<8x128xf32, #tpu.memory_space<vmem>>) attributes {dimension_semantics = [#tpu.dimension_semantics<arbitrary>], iteration_bounds = array<i64: 7>, scalar_prefetch = 1 : i64, scratch_operands = 3 : i64, tpu.core_type = #tpu.core_type<tc>, window_params = [{pipeline_mode = #tpu.pipeline_mode<synchronous>, transform_indices = @transform_0, window_bounds = array<i64: 2, 8, 128>}, {transform_indices = @transform_1, window_bounds = array<i64: 1, 8, 128>}, {pipeline_mode = #tpu.pipeline_mode<synchronous>, transform_indices = @transform_2, window_bounds = array<i64: 2, 256, 512>}, {pipeline_mode = #tpu.pipeline_mode<synchronous>, transform_indices = @transform_3, window_bounds = array<i64: 2, 1, 512>}, {pipeline_mode = #tpu.pipeline_mode<synchronous>, transform_indices = @transform_4, window_bounds = array<i64: 128, 128>}, {pipeline_mode = #tpu.pipeline_mode<synchronous>, transform_indices = @transform_5, window_bounds = array<i64: 1, 128>}, {pipeline_mode = #tpu.pipeline_mode<synchronous>, transform_indices = @transform_6, window_bounds = array<i64: 128, 128>}, {transform_indices = @transform_7, window_bounds = array<i64: 1, 8, 128>}]} {
    %c0_i32 = arith.constant 0 : i32
    %0 = arith.cmpi eq, %arg0, %c0_i32 : i32
    %1 = arith.extui %0 : i1 to i32
    %c0_i32_0 = arith.constant 0 : i32
    %2 = arith.cmpi ne, %1, %c0_i32_0 : i32
    scf.if %2 {
      %c0_62 = arith.constant 0 : index
      %c0_63 = arith.constant 0 : index
      %c0_64 = arith.constant 0 : index
      %121 = vector.load %arg2[%c0_62, %c0_63, %c0_64] : memref<2x8x128xf32, #tpu.memory_space<vmem>>, vector<2x8x128xf32>
      %c0_65 = arith.constant 0 : index
      %c0_66 = arith.constant 0 : index
      %c0_67 = arith.constant 0 : index
      %122 = vector.load %arg10[%c0_65, %c0_66, %c0_67] : memref<2x8x128xf32, #tpu.memory_space<vmem>>, vector<2x8x128xf32>
      tpu.vector_store %arg10[%c0_65, %c0_66, %c0_67], %121 {strides = array<i32>} : memref<2x8x128xf32, #tpu.memory_space<vmem>>, vector<2x8x128xf32>,
      %c0_68 = arith.constant 0 : index
      %c0_69 = arith.constant 0 : index
      %c0_70 = arith.constant 0 : index
      %123 = vector.load %arg2[%c0_68, %c0_69, %c0_70] : memref<2x8x128xf32, #tpu.memory_space<vmem>>, vector<2x8x128xf32>
      %c0_71 = arith.constant 0 : index
      %c0_72 = arith.constant 0 : index
      %c0_73 = arith.constant 0 : index
      %124 = vector.load %arg11[%c0_71, %c0_72, %c0_73] : memref<2x8x128xf32, #tpu.memory_space<vmem>>, vector<2x8x128xf32>
      tpu.vector_store %arg11[%c0_71, %c0_72, %c0_73], %123 {strides = array<i32>} : memref<2x8x128xf32, #tpu.memory_space<vmem>>, vector<2x8x128xf32>,
    } else {
    }
    %c0_i32_1 = arith.constant 0 : i32
    %3 = arith.cmpi eq, %arg0, %c0_i32_1 : i32
    %4 = arith.index_cast %arg0 : i32 to index
    %5 = memref.load %arg1[%4] : memref<8xi32, #tpu.memory_space<smem>>
    %c0_i32_2 = arith.constant 0 : i32
    %6 = arith.cmpi ne, %5, %c0_i32_2 : i32
    %7 = arith.ori %3, %6 : i1
    %8 = arith.extui %7 : i1 to i32
    %c0_i32_3 = arith.constant 0 : i32
    %9 = arith.cmpi ne, %8, %c0_i32_3 : i32
    scf.if %9 {
      %c0_62 = arith.constant 0 : index
      %c0_63 = arith.constant 0 : index
      %c0_64 = arith.constant 0 : index
      %121 = vector.load %arg3[%c0_62, %c0_63, %c0_64] : memref<1x8x128xf32, #tpu.memory_space<vmem>>, vector<1x8x128xf32>
      %122 = vector.shape_cast %121 : vector<1x8x128xf32> to vector<8x128xf32>
      %c0_65 = arith.constant 0 : index
      %c0_66 = arith.constant 0 : index
      %123 = vector.load %arg12[%c0_65, %c0_66] : memref<8x128xf32, #tpu.memory_space<vmem>>, vector<8x128xf32>
      tpu.vector_store %arg12[%c0_65, %c0_66], %122 {strides = array<i32>} : memref<8x128xf32, #tpu.memory_space<vmem>>, vector<8x128xf32>,
    } else {
    }
    %c0 = arith.constant 0 : index
    %c0_4 = arith.constant 0 : index
    %10 = vector.load %arg12[%c0, %c0_4] : memref<8x128xf32, #tpu.memory_space<vmem>>, vector<8x128xf32>
    %c0_5 = arith.constant 0 : index
    %c0_6 = arith.constant 0 : index
    %c0_7 = arith.constant 0 : index
    %11 = vector.load %arg10[%c0_5, %c0_6, %c0_7] : memref<2x8x128xf32, #tpu.memory_space<vmem>>, vector<1x8x128xf32>
    %12 = vector.shape_cast %11 : vector<1x8x128xf32> to vector<8x128xf32>
    %13 = tpu.concatenate %10, %12 in 1 : vector<8x128xf32>, vector<8x128xf32> -> vector<8x256xf32>
    %c0_8 = arith.constant 0 : index
    %c0_9 = arith.constant 0 : index
    %c0_10 = arith.constant 0 : index
    %14 = vector.load %arg4[%c0_8, %c0_9, %c0_10] : memref<2x256x512xf32, #tpu.memory_space<vmem>>, vector<1x256x512xf32>
    %15 = vector.shape_cast %14 : vector<1x256x512xf32> to vector<256x512xf32>
    %cst = arith.constant dense<0.000000e+00> : vector<8x512xf32>
    %16 = tpu.matmul %13, %15, %cst {dimension_numbers = #tpu.dot_dimension_numbers<[1], [0], [0], [1], [0, 0, 1, 1], [], []>} : vector<8x256xf32>, vector<256x512xf32>, vector<8x512xf32> -> vector<8x512xf32>
    %c0_11 = arith.constant 0 : index
    %c0_12 = arith.constant 0 : index
    %c0_13 = arith.constant 0 : index
    %17 = vector.load %arg5[%c0_11, %c0_12, %c0_13] : memref<2x1x512xf32, #tpu.memory_space<vmem>>, vector<1x1x512xf32>
    %18 = vector.shape_cast %17 : vector<1x1x512xf32> to vector<1x512xf32>
    %19 = vector.broadcast %18 : vector<1x512xf32> to vector<8x512xf32>
    %20 = arith.addf %16, %19 : vector<8x512xf32>
    %21 = vector.extract_strided_slice %20 {offsets = [0, 0], sizes = [8, 128], strides = [1, 1]} : vector<8x512xf32> to vector<8x128xf32>
    %22 = arith.negf %21 : vector<8x128xf32>
    %23 = math.exp %22 : vector<8x128xf32>
    %cst_14 = arith.constant 1.000000e+00 : f32
    %24 = vector.broadcast %cst_14 : f32 to vector<8x128xf32>
    %25 = arith.addf %24, %23 : vector<8x128xf32>
    %26 = arith.divf %24, %25 : vector<8x128xf32>
    %27 = vector.extract_strided_slice %20 {offsets = [0, 128], sizes = [8, 128], strides = [1, 1]} : vector<8x512xf32> to vector<8x128xf32>
    %28 = arith.negf %27 : vector<8x128xf32>
    %29 = math.exp %28 : vector<8x128xf32>
    %cst_15 = arith.constant 1.000000e+00 : f32
    %30 = vector.broadcast %cst_15 : f32 to vector<8x128xf32>
    %31 = arith.addf %30, %29 : vector<8x128xf32>
    %32 = arith.divf %30, %31 : vector<8x128xf32>
    %33 = vector.extract_strided_slice %20 {offsets = [0, 256], sizes = [8, 128], strides = [1, 1]} : vector<8x512xf32> to vector<8x128xf32>
    %34 = math.tanh %33 : vector<8x128xf32>
    %35 = vector.extract_strided_slice %20 {offsets = [0, 384], sizes = [8, 128], strides = [1, 1]} : vector<8x512xf32> to vector<8x128xf32>
    %36 = arith.negf %35 : vector<8x128xf32>
    %37 = math.exp %36 : vector<8x128xf32>
    %cst_16 = arith.constant 1.000000e+00 : f32
    %38 = vector.broadcast %cst_16 : f32 to vector<8x128xf32>
    %39 = arith.addf %38, %37 : vector<8x128xf32>
    %40 = arith.divf %38, %39 : vector<8x128xf32>
    %c0_17 = arith.constant 0 : index
    %c0_18 = arith.constant 0 : index
    %c0_19 = arith.constant 0 : index
    %41 = vector.load %arg11[%c0_17, %c0_18, %c0_19] : memref<2x8x128xf32, #tpu.memory_space<vmem>>, vector<1x8x128xf32>
    %42 = vector.shape_cast %41 : vector<1x8x128xf32> to vector<8x128xf32>
    %43 = arith.mulf %32, %42 : vector<8x128xf32>
    %44 = arith.mulf %26, %34 : vector<8x128xf32>
    %45 = arith.addf %43, %44 : vector<8x128xf32>
    %46 = math.tanh %45 : vector<8x128xf32>
    %47 = arith.mulf %40, %46 : vector<8x128xf32>
    %c0_20 = arith.constant 0 : index
    %c0_21 = arith.constant 0 : index
    %c0_22 = arith.constant 0 : index
    %48 = vector.load %arg11[%c0_20, %c0_21, %c0_22] : memref<2x8x128xf32, #tpu.memory_space<vmem>>, vector<1x8x128xf32>
    %49 = vector.shape_cast %48 : vector<1x8x128xf32> to vector<8x128xf32>
    %50 = vector.shape_cast %45 : vector<8x128xf32> to vector<1x8x128xf32>
    tpu.vector_store %arg11[%c0_20, %c0_21, %c0_22], %50 {strides = array<i32>} : memref<2x8x128xf32, #tpu.memory_space<vmem>>, vector<1x8x128xf32>,
    %c0_23 = arith.constant 0 : index
    %c0_24 = arith.constant 0 : index
    %c0_25 = arith.constant 0 : index
    %51 = vector.load %arg10[%c0_23, %c0_24, %c0_25] : memref<2x8x128xf32, #tpu.memory_space<vmem>>, vector<1x8x128xf32>
    %52 = vector.shape_cast %51 : vector<1x8x128xf32> to vector<8x128xf32>
    %53 = vector.shape_cast %47 : vector<8x128xf32> to vector<1x8x128xf32>
    tpu.vector_store %arg10[%c0_23, %c0_24, %c0_25], %53 {strides = array<i32>} : memref<2x8x128xf32, #tpu.memory_space<vmem>>, vector<1x8x128xf32>,
    %c1 = arith.constant 1 : index
    %c0_26 = arith.constant 0 : index
    %c0_27 = arith.constant 0 : index
    %54 = vector.load %arg10[%c1, %c0_26, %c0_27] : memref<2x8x128xf32, #tpu.memory_space<vmem>>, vector<1x8x128xf32>
    %55 = vector.shape_cast %54 : vector<1x8x128xf32> to vector<8x128xf32>
    %56 = tpu.concatenate %47, %55 in 1 : vector<8x128xf32>, vector<8x128xf32> -> vector<8x256xf32>
    %c1_28 = arith.constant 1 : index
    %c0_29 = arith.constant 0 : index
    %c0_30 = arith.constant 0 : index
    %57 = vector.load %arg4[%c1_28, %c0_29, %c0_30] : memref<2x256x512xf32, #tpu.memory_space<vmem>>, vector<1x256x512xf32>
    %58 = vector.shape_cast %57 : vector<1x256x512xf32> to vector<256x512xf32>
    %cst_31 = arith.constant dense<0.000000e+00> : vector<8x512xf32>
    %59 = tpu.matmul %56, %58, %cst_31 {dimension_numbers = #tpu.dot_dimension_numbers<[1], [0], [0], [1], [0, 0, 1, 1], [], []>} : vector<8x256xf32>, vector<256x512xf32>, vector<8x512xf32> -> vector<8x512xf32>
    %c1_32 = arith.constant 1 : index
    %c0_33 = arith.constant 0 : index
    %c0_34 = arith.constant 0 : index
    %60 = vector.load %arg5[%c1_32, %c0_33, %c0_34] : memref<2x1x512xf32, #tpu.memory_space<vmem>>, vector<1x1x512xf32>
    %61 = vector.shape_cast %60 : vector<1x1x512xf32> to vector<1x512xf32>
    %62 = vector.broadcast %61 : vector<1x512xf32> to vector<8x512xf32>
    %63 = arith.addf %59, %62 : vector<8x512xf32>
    %64 = vector.extract_strided_slice %63 {offsets = [0, 0], sizes = [8, 128], strides = [1, 1]} : vector<8x512xf32> to vector<8x128xf32>
    %65 = arith.negf %64 : vector<8x128xf32>
    %66 = math.exp %65 : vector<8x128xf32>
    %cst_35 = arith.constant 1.000000e+00 : f32
    %67 = vector.broadcast %cst_35 : f32 to vector<8x128xf32>
    %68 = arith.addf %67, %66 : vector<8x128xf32>
    %69 = arith.divf %67, %68 : vector<8x128xf32>
    %70 = vector.extract_strided_slice %63 {offsets = [0, 128], sizes = [8, 128], strides = [1, 1]} : vector<8x512xf32> to vector<8x128xf32>
    %71 = arith.negf %70 : vector<8x128xf32>
    %72 = math.exp %71 : vector<8x128xf32>
    %cst_36 = arith.constant 1.000000e+00 : f32
    %73 = vector.broadcast %cst_36 : f32 to vector<8x128xf32>
    %74 = arith.addf %73, %72 : vector<8x128xf32>
    %75 = arith.divf %73, %74 : vector<8x128xf32>
    %76 = vector.extract_strided_slice %63 {offsets = [0, 256], sizes = [8, 128], strides = [1, 1]} : vector<8x512xf32> to vector<8x128xf32>
    %77 = math.tanh %76 : vector<8x128xf32>
    %78 = vector.extract_strided_slice %63 {offsets = [0, 384], sizes = [8, 128], strides = [1, 1]} : vector<8x512xf32> to vector<8x128xf32>
    %79 = arith.negf %78 : vector<8x128xf32>
    %80 = math.exp %79 : vector<8x128xf32>
    %cst_37 = arith.constant 1.000000e+00 : f32
    %81 = vector.broadcast %cst_37 : f32 to vector<8x128xf32>
    %82 = arith.addf %81, %80 : vector<8x128xf32>
    %83 = arith.divf %81, %82 : vector<8x128xf32>
    %c1_38 = arith.constant 1 : index
    %c0_39 = arith.constant 0 : index
    %c0_40 = arith.constant 0 : index
    %84 = vector.load %arg11[%c1_38, %c0_39, %c0_40] : memref<2x8x128xf32, #tpu.memory_space<vmem>>, vector<1x8x128xf32>
    %85 = vector.shape_cast %84 : vector<1x8x128xf32> to vector<8x128xf32>
    %86 = arith.mulf %75, %85 : vector<8x128xf32>
    %87 = arith.mulf %69, %77 : vector<8x128xf32>
    %88 = arith.addf %86, %87 : vector<8x128xf32>
    %89 = math.tanh %88 : vector<8x128xf32>
    %90 = arith.mulf %83, %89 : vector<8x128xf32>
    %c1_41 = arith.constant 1 : index
    %c0_42 = arith.constant 0 : index
    %c0_43 = arith.constant 0 : index
    %91 = vector.load %arg11[%c1_41, %c0_42, %c0_43] : memref<2x8x128xf32, #tpu.memory_space<vmem>>, vector<1x8x128xf32>
    %92 = vector.shape_cast %91 : vector<1x8x128xf32> to vector<8x128xf32>
    %93 = vector.shape_cast %88 : vector<8x128xf32> to vector<1x8x128xf32>
    tpu.vector_store %arg11[%c1_41, %c0_42, %c0_43], %93 {strides = array<i32>} : memref<2x8x128xf32, #tpu.memory_space<vmem>>, vector<1x8x128xf32>,
    %c1_44 = arith.constant 1 : index
    %c0_45 = arith.constant 0 : index
    %c0_46 = arith.constant 0 : index
    %94 = vector.load %arg10[%c1_44, %c0_45, %c0_46] : memref<2x8x128xf32, #tpu.memory_space<vmem>>, vector<1x8x128xf32>
    %95 = vector.shape_cast %94 : vector<1x8x128xf32> to vector<8x128xf32>
    %96 = vector.shape_cast %90 : vector<8x128xf32> to vector<1x8x128xf32>
    tpu.vector_store %arg10[%c1_44, %c0_45, %c0_46], %96 {strides = array<i32>} : memref<2x8x128xf32, #tpu.memory_space<vmem>>, vector<1x8x128xf32>,
    %c0_47 = arith.constant 0 : index
    %c0_48 = arith.constant 0 : index
    %97 = vector.load %arg6[%c0_47, %c0_48] : memref<128x128xf32, #tpu.memory_space<vmem>>, vector<128x128xf32>
    %cst_49 = arith.constant dense<0.000000e+00> : vector<8x128xf32>
    %98 = tpu.matmul %90, %97, %cst_49 {dimension_numbers = #tpu.dot_dimension_numbers<[1], [0], [0], [1], [0, 0, 1, 1], [], []>} : vector<8x128xf32>, vector<128x128xf32>, vector<8x128xf32> -> vector<8x128xf32>
    %c0_50 = arith.constant 0 : index
    %c0_51 = arith.constant 0 : index
    %99 = vector.load %arg7[%c0_50, %c0_51] : memref<1x128xf32, #tpu.memory_space<vmem>>, vector<1x128xf32>
    %100 = vector.broadcast %99 : vector<1x128xf32> to vector<8x128xf32>
    %101 = arith.addf %98, %100 : vector<8x128xf32>
    %c0_52 = arith.constant 0 : index
    %c0_53 = arith.constant 0 : index
    %c0_54 = arith.constant 0 : index
    %102 = vector.load %arg9[%c0_52, %c0_53, %c0_54] : memref<1x8x128xf32, #tpu.memory_space<vmem>>, vector<1x8x128xf32>
    %103 = vector.shape_cast %102 : vector<1x8x128xf32> to vector<8x128xf32>
    %104 = vector.shape_cast %101 : vector<8x128xf32> to vector<1x8x128xf32>
    tpu.vector_store %arg9[%c0_52, %c0_53, %c0_54], %104 {strides = array<i32>} : memref<1x8x128xf32, #tpu.memory_space<vmem>>, vector<1x8x128xf32>,
    %105 = tpu.iota {dimensions = array<i32: 1>} : vector<8x128xi32>
    %cst_55 = arith.constant dense<0xFF800000> : vector<8xf32>
    %106 = vector.multi_reduction <maximumf>, %101, %cst_55 [1] : vector<8x128xf32> to vector<8xf32>
    %107 = vector.shape_cast %106 : vector<8xf32> to vector<8x1xf32>
    %108 = vector.broadcast %107 : vector<8x1xf32> to vector<8x128xf32>
    %109 = arith.cmpf oeq, %101, %108 : vector<8x128xf32>
    %c128_i32 = arith.constant 128 : i32
    %110 = vector.broadcast %c128_i32 : i32 to vector<8x128xi32>
    %111 = arith.select %109, %105, %110 : vector<8x128xi1>, vector<8x128xi32>
    %cst_56 = arith.constant dense<2147483647> : vector<8xi32>
    %112 = vector.multi_reduction <minsi>, %111, %cst_56 [1] : vector<8x128xi32> to vector<8xi32>
    %113 = vector.shape_cast %112 : vector<8xi32> to vector<8x1xi32>
    %114 = vector.broadcast %113 : vector<8x1xi32> to vector<8x128xi32>
    %115 = arith.cmpi eq, %105, %114 : vector<8x128xi32>
    %116 = arith.extui %115 : vector<8x128xi1> to vector<8x128xi32>
    %117 = arith.sitofp %116 : vector<8x128xi32> to vector<8x128xf32>
    %c0_57 = arith.constant 0 : index
    %c0_58 = arith.constant 0 : index
    %118 = vector.load %arg8[%c0_57, %c0_58] : memref<128x128xf32, #tpu.memory_space<vmem>>, vector<128x128xf32>
    %cst_59 = arith.constant dense<0.000000e+00> : vector<8x128xf32>
    %119 = tpu.matmul %117, %118, %cst_59 {dimension_numbers = #tpu.dot_dimension_numbers<[1], [0], [0], [1], [0, 0, 1, 1], [], []>} : vector<8x128xf32>, vector<128x128xf32>, vector<8x128xf32> -> vector<8x128xf32>
    %c0_60 = arith.constant 0 : index
    %c0_61 = arith.constant 0 : index
    %120 = vector.load %arg12[%c0_60, %c0_61] : memref<8x128xf32, #tpu.memory_space<vmem>>, vector<8x128xf32>
    tpu.vector_store %arg12[%c0_60, %c0_61], %119 {strides = array<i32>} : memref<8x128xf32, #tpu.memory_space<vmem>>, vector<8x128xf32>,
    return
  }
  func.func @transform_0(%arg0: i32, %arg1: memref<8xi32, #tpu.memory_space<smem>>) -> (i32, i32, i32) {
    %c0_i32 = arith.constant 0 : i32
    %c0_i32_0 = arith.constant 0 : i32
    %c0_i32_1 = arith.constant 0 : i32
    %c0_i32_2 = arith.constant 0 : i32
    return %c0_i32, %c0_i32_0, %c0_i32_1 : i32, i32, i32
  }
  func.func @transform_1(%arg0: i32, %arg1: memref<8xi32, #tpu.memory_space<smem>>) -> (i32, i32, i32) {
    %c0_i32 = arith.constant 0 : i32
    %c0_i32_0 = arith.constant 0 : i32
    %c0_i32_1 = arith.constant 0 : i32
    return %arg0, %c0_i32, %c0_i32_0 : i32, i32, i32
  }
  func.func @transform_2(%arg0: i32, %arg1: memref<8xi32, #tpu.memory_space<smem>>) -> (i32, i32, i32) {
    %c0_i32 = arith.constant 0 : i32
    %c0_i32_0 = arith.constant 0 : i32
    %c0_i32_1 = arith.constant 0 : i32
    %c0_i32_2 = arith.constant 0 : i32
    return %c0_i32, %c0_i32_0, %c0_i32_1 : i32, i32, i32
  }
  func.func @transform_3(%arg0: i32, %arg1: memref<8xi32, #tpu.memory_space<smem>>) -> (i32, i32, i32) {
    %c0_i32 = arith.constant 0 : i32
    %c0_i32_0 = arith.constant 0 : i32
    %c0_i32_1 = arith.constant 0 : i32
    %c0_i32_2 = arith.constant 0 : i32
    return %c0_i32, %c0_i32_0, %c0_i32_1 : i32, i32, i32
  }
  func.func @transform_4(%arg0: i32, %arg1: memref<8xi32, #tpu.memory_space<smem>>) -> (i32, i32) {
    %c0_i32 = arith.constant 0 : i32
    %c0_i32_0 = arith.constant 0 : i32
    %c0_i32_1 = arith.constant 0 : i32
    return %c0_i32, %c0_i32_0 : i32, i32
  }
  func.func @transform_5(%arg0: i32, %arg1: memref<8xi32, #tpu.memory_space<smem>>) -> (i32, i32) {
    %c0_i32 = arith.constant 0 : i32
    %c0_i32_0 = arith.constant 0 : i32
    %c0_i32_1 = arith.constant 0 : i32
    return %c0_i32, %c0_i32_0 : i32, i32
  }
  func.func @transform_6(%arg0: i32, %arg1: memref<8xi32, #tpu.memory_space<smem>>) -> (i32, i32) {
    %c0_i32 = arith.constant 0 : i32
    %c0_i32_0 = arith.constant 0 : i32
    %c0_i32_1 = arith.constant 0 : i32
    return %c0_i32, %c0_i32_0 : i32, i32
  }
  func.func @transform_7(%arg0: i32, %arg1: memref<8xi32, #tpu.memory_space<smem>>) -> (i32, i32, i32) {
    %c0_i32 = arith.constant 0 : i32
    %c0_i32_0 = arith.constant 0 : i32
    %c0_i32_1 = arith.constant 0 : i32
    return %arg0, %c0_i32, %c0_i32_0 : i32, i32, i32
  }
}

</mosaic_0001>

<bundles_post_ra>
// kernel: encoder_decoder_forward.3
= control target key start
LH: loop header
LB: loop body
LE: loop exit
PB: predicated region body
PF: predicated region fallthrough
CT: control target
= control target key end

     0   :  { %s1354_s30 = smov [#allocation6]   ;;  %s1638_s0 = inlined_call_operand.vmem [shape: s32[8], index: 0, kind: input, shape index: {}]   ;;  %s1639_s1 = inlined_call_operand.vmem [shape: f32[2,8,128], index: 1, kind: input, shape index: {}]   ;;  %s1640_s2 = inlined_call_operand.vmem [shape: f32[8,8,128], index: 2, kind: input, shape index: {}]   ;;  %s1641_s3 = inlined_call_operand.hbm [shape: f32[2,256,512], index: 3, kind: input, shape index: {}]   ;;  %s1642_s4 = inlined_call_operand.vmem [shape: f32[2,1,512], index: 4, kind: input, shape index: {}]   ;;  %s1643_s5 = inlined_call_operand.vmem [shape: f32[128,128], index: 5, kind: input, shape index: {}]   ;;  %s1644_s6 = inlined_call_operand.vmem [shape: f32[1,128], index: 6, kind: input, shape index: {}]   ;;  %s1645_s7 = inlined_call_operand.vmem [shape: f32[128,128], index: 7, kind: input, shape index: {}]   ;;  %s1646_s8 = inlined_call_operand.vmem [shape: f32[7,8,128], index: 8, kind: output, shape index: {}]  }
   0x1   :  { %s14_s29 = sshll.u32 %s1638_s0, 4  ;;  %s15_s29 = int_to_ptr.vmem [resolvable:$true] %s14_s29 }
   0x2   :  { %17 = dma.vmem_to_smem %s15_s29, 16, %s1354_s30, [#allocation5] }
   0x3   :  { %1344 = dma.done.wait [#allocation5], 16 }
   0x4   :  { %1345 = vsyncadd [#allocation5], 4294967280 }
   0x5   :  { %20 = sfence }
   0x6   :  { %21 = vsyncpa [#allocation8], 0  ;;  %s1407_s9 = smov 0  }
   0x7 LB: > { %s224_s0 = sshll.u32 %s1641_s3, 4  ;;  %s1416_s12 = sadd.s32 4294967295, %s1352_s9   ;;  %s1352_s9 = sphi %s1407_s9, %s27_s9   ;;  %s225_s0 = int_to_ptr.hbm [resolvable:$true] %s224_s0 }
   0x8   : > { %p1223_p0 = scmp.ge.s32.totalorder %s1352_s9, 1  ;;  %p210_p1 = scmp.lt.s32.totalorder %s1352_s9, 8 }
   0x9   : > { %p1224_p2 = scmp.ne.s32.totalorder %s1416_s12, 0  ;;  %p1250_p3 = scmp.eq.s32.totalorder %s1416_s12, 0 }
   0xa   : > { %p211_p4 = pnand %p1223_p0, %p210_p1  ;;  %s1355_s13 = smov [#allocation7]  }
   0xb   : > { %s226_s14 = sshll.u32 %s1355_s13, 4  ;;  %s1356_s15 = smov 512   ;;  %s227_s14 = int_to_ptr.vmem [resolvable:$true] %s226_s14 }
   0xc   : > { %p1246_p5 = pneg %p211_p4  ;;  %s1357_s16 = smov 32  }
   0xd   : > { %261 = sbr.rel (%p211_p4) target bundleno = 1073 (0x431), region = 48 }
   0xe   : > { %p1247_p6 = pnand %p1250_p3, %p1246_p5 }
  0x10   : > { %1249 = dma.hbm_to_vmem [thread:$0]  (!%p1247_p6), %s225_s0, 32768, %s227_s14, [#allocation8], %s1356_s15, %s1356_s15, %s1357_s16  }
  0x12   : > { %1347 = dma.done.wait (%p1250_p3), [#allocation8], 32768  }
  0x13   : > { %1349 = vsyncadd (%p1250_p3), [#allocation8], 4294934528  ;;  %p292_p7 = scmp.lt.s32.totalorder %s1416_s12, 7  ;;  %p296_p8 = scmp.lt.s32.totalorder %s1416_s12, 6 }
  0x15   : > { %s293_s17 = scalar_select %p292_p7, %s1416_s12, 7 }
  0x16   : > { %s297_s18 = scalar_select %p296_p8, %s1416_s12, 6 }
  0x17   : > { %s1228_s19 = sshll.u32 %s293_s17, 3  ;;  %303 = sbr.rel (%p1224_p2) target bundleno = 33 (0x21), region = 56 }
  0x18   : > { %s295_s22 = scalar_lea.vmem %s1640_s2, %s1228_s19  ;;  %s1229_s23 = sshll.u32 %s297_s18, 3 }
  0x19   : > { %s1438_s26 = scalar_lea.vmem %s1646_s8, %s1229_s23 }
  0x1c   : > { %v304_v0 = vld [vmem:[%s1639_s1] sm:$0xff]  ;;  %v305_v1 = vld [vmem:[%s1639_s1 + $0x8] sm:$0xff] }
  0x1d   : > { %306 = vst [vmem:[#allocation2] sm:$0xff] %v304_v0 }
  0x1e   : > { %307 = vst [vmem:[#allocation2 + $0x8] sm:$0xff] %v305_v1 }
  0x1f   : > { %310 = vst [vmem:[#allocation3 + $0x8] sm:$0xff] %v304_v0 }
  0x20   : > { %311 = vst [vmem:[#allocation3] sm:$0xff] %v305_v1 }
  0x21 PF: > { %s312_s10 = sld [smem:[#allocation6 + %s1416_s12]] }
  0x27   : > { %p313_p9 = scmp.ne.s32.totalorder %s312_s10, 0 }
  0x29   : > { %p314_p10 = por %p1250_p3, %p313_p9 }
  0x2a   : > { %v318_v2 = vld [vmem:[%s295_s22] sm:$0xff] (%p314_p10) }
  0x2b   : > { %317 = sbr.rel (!%p314_p10) target bundleno = 48 (0x30), region = 60  ;;  %319 = vst [vmem:[#allocation4] sm:$0xff] (%p314_p10), %v318_v2 }
  0x30 PF: > { %v383_v3 = vld [vmem:[#allocation7 + $0x1e8] sm:$0xff]  ;;  %v382_v6 = vld [vmem:[#allocation7 + $0x1e0] sm:$0xff]  ;;  %v385_v0 = vld [vmem:[#allocation7 + $0x1f8] sm:$0xff] }
  0x31   : > { %v379_v4 = vld [vmem:[#allocation7 + $0x1c8] sm:$0xff]  ;;  %500 = vmatpush.msra.mxu2 %v383_v3  ;;  %460 = vmatpush.msra.mxu0 %v382_v6  ;;  %v378_v9 = vld [vmem:[#allocation7 + $0x1c0] sm:$0xff]  ;;  %v449_v3 = vld [vmem:[#allocation7 + $0x3f8] sm:$0xff] }
  0x32   : > { %v447_v5 = vld [vmem:[#allocation7 + $0x3e8] sm:$0xff]  ;;  %v446_v10 = vld [vmem:[#allocation7 + $0x3e0] sm:$0xff] }
  0x33   : > { %520 = vmatpush.msra.mxu3 %v447_v5  ;;  %v443_v7 = vld [vmem:[#allocation7 + $0x3c8] sm:$0xff]  ;;  %501 = vmatpush.msra.mxu2 %v379_v4  ;;  %v374_v12 = vld [vmem:[#allocation7 + $0x1a0] sm:$0xff]  ;;  %v381_v4 = vld [vmem:[#allocation7 + $0x1d8] sm:$0xff] }
  0x34   : > { %v375_v8 = vld [vmem:[#allocation7 + $0x1a8] sm:$0xff]  ;;  %v442_v13 = vld [vmem:[#allocation7 + $0x3c0] sm:$0xff]  ;;  %461 = vmatpush.msra.mxu0 %v378_v9  ;;  %480 = vmatpush.msra.mxu1 %v446_v10  ;;  %v384_v5 = vld [vmem:[#allocation7 + $0x1f0] sm:$0xff] }
  0x35   : > { %521 = vmatpush.msra.mxu3 %v443_v7  ;;  %v439_v11 = vld [vmem:[#allocation7 + $0x3a8] sm:$0xff]  ;;  %502 = vmatpush.msra.mxu2 %v375_v8  ;;  %v370_v16 = vld [vmem:[#allocation7 + $0x180] sm:$0xff]  ;;  %v445_v7 = vld [vmem:[#allocation7 + $0x3d8] sm:$0xff] }
  0x36   : > { %v371_v14 = vld [vmem:[#allocation7 + $0x188] sm:$0xff]  ;;  %v438_v17 = vld [vmem:[#allocation7 + $0x3a0] sm:$0xff]  ;;  %462 = vmatpush.msra.mxu0 %v374_v12  ;;  %481 = vmatpush.msra.mxu1 %v442_v13  ;;  %v377_v8 = vld [vmem:[#allocation7 + $0x1b8] sm:$0xff] }
  0x37   : > { %v435_v15 = vld [vmem:[#allocation7 + $0x388] sm:$0xff]  ;;  %522 = vmatpush.msra.mxu3 %v439_v11  ;;  %503 = vmatpush.msra.mxu2 %v371_v14  ;;  %v366_v20 = vld [vmem:[#allocation7 + $0x160] sm:$0xff]  ;;  %v380_v9 = vld [vmem:[#allocation7 + $0x1d0] sm:$0xff] }
  0x38   : > { %v367_v18 = vld [vmem:[#allocation7 + $0x168] sm:$0xff]  ;;  %v434_v21 = vld [vmem:[#allocation7 + $0x380] sm:$0xff]  ;;  %463 = vmatpush.msra.mxu0 %v370_v16  ;;  %482 = vmatpush.msra.mxu1 %v438_v17  ;;  %v448_v10 = vld [vmem:[#allocation7 + $0x3f0] sm:$0xff] }
  0x39   : > { %v431_v19 = vld [vmem:[#allocation7 + $0x368] sm:$0xff]  ;;  %523 = vmatpush.msra.mxu3 %v435_v15  ;;  %504 = vmatpush.msra.mxu2 %v367_v18  ;;  %v362_v24 = vld [vmem:[#allocation7 + $0x140] sm:$0xff]  ;;  %v441_v11 = vld [vmem:[#allocation7 + $0x3b8] sm:$0xff] }
  0x3a   : > { %v363_v22 = vld [vmem:[#allocation7 + $0x148] sm:$0xff]  ;;  %v430_v25 = vld [vmem:[#allocation7 + $0x360] sm:$0xff]  ;;  %464 = vmatpush.msra.mxu0 %v366_v20  ;;  %483 = vmatpush.msra.mxu1 %v434_v21  ;;  %v373_v12 = vld [vmem:[#allocation7 + $0x198] sm:$0xff] }
  0x3b   : > { %v427_v23 = vld [vmem:[#allocation7 + $0x348] sm:$0xff]  ;;  %524 = vmatpush.msra.mxu3 %v431_v19  ;;  %505 = vmatpush.msra.mxu2 %v363_v22  ;;  %v358_v28 = vld [vmem:[#allocation7 + $0x120] sm:$0xff]  ;;  %v376_v13 = vld [vmem:[#allocation7 + $0x1b0] sm:$0xff] }
  0x3c   : > { %v359_v26 = vld [vmem:[#allocation7 + $0x128] sm:$0xff]  ;;  %v426_v29 = vld [vmem:[#allocation7 + $0x340] sm:$0xff]  ;;  %465 = vmatpush.msra.mxu0 %v362_v24  ;;  %484 = vmatpush.msra.mxu1 %v430_v25  ;;  %v1451_v14 = vld [vmem:[#allocation4] sm:$0xff] }
  0x3d   : > { %v423_v27 = vld [vmem:[#allocation7 + $0x328] sm:$0xff]  ;;  %525 = vmatpush.msra.mxu3 %v427_v23  ;;  %506 = vmatpush.msra.mxu2 %v359_v26  ;;  %v354_v32 = vld [vmem:[#allocation7 + $0x100] sm:$0xff]  ;;  %v444_v15 = vld [vmem:[#allocation7 + $0x3d0] sm:$0xff] }
  0x3e   : > { %v355_v30 = vld [vmem:[#allocation7 + $0x108] sm:$0xff]  ;;  %v422_v33 = vld [vmem:[#allocation7 + $0x320] sm:$0xff]  ;;  %466 = vmatpush.msra.mxu0 %v358_v28  ;;  %485 = vmatpush.msra.mxu1 %v426_v29  ;;  %v369_v16 = vld [vmem:[#allocation7 + $0x178] sm:$0xff] }
  0x3f   : > { %v419_v31 = vld [vmem:[#allocation7 + $0x308] sm:$0xff]  ;;  %526 = vmatpush.msra.mxu3 %v423_v27  ;;  %507 = vmatpush.msra.mxu2 %v355_v30  ;;  %v350_v36 = vld [vmem:[#allocation7 + $0xe0] sm:$0xff]  ;;  %v437_v17 = vld [vmem:[#allocation7 + $0x398] sm:$0xff] }
  0x40   : > { %v351_v34 = vld [vmem:[#allocation7 + $0xe8] sm:$0xff]  ;;  %v418_v37 = vld [vmem:[#allocation7 + $0x300] sm:$0xff]  ;;  %467 = vmatpush.msra.mxu0 %v354_v32  ;;  %486 = vmatpush.msra.mxu1 %v422_v33  ;;  %v1453_v18 = vld [vmem:[#allocation2] sm:$0xff] }
  0x41   : > { %v415_v35 = vld [vmem:[#allocation7 + $0x2e8] sm:$0xff]  ;;  %527 = vmatpush.msra.mxu3 %v419_v31  ;;  %508 = vmatpush.msra.mxu2 %v351_v34  ;;  %v346_v40 = vld [vmem:[#allocation7 + $0xc0] sm:$0xff]  ;;  %v372_v19 = vld [vmem:[#allocation7 + $0x190] sm:$0xff] }
  0x42   : > { %v347_v38 = vld [vmem:[#allocation7 + $0xc8] sm:$0xff]  ;;  %v414_v41 = vld [vmem:[#allocation7 + $0x2e0] sm:$0xff]  ;;  %468 = vmatpush.msra.mxu0 %v350_v36  ;;  %487 = vmatpush.msra.mxu1 %v418_v37  ;;  %v440_v20 = vld [vmem:[#allocation7 + $0x3b0] sm:$0xff] }
  0x43   : > { %v411_v39 = vld [vmem:[#allocation7 + $0x2c8] sm:$0xff]  ;;  %528 = vmatpush.msra.mxu3 %v415_v35  ;;  %509 = vmatpush.msra.mxu2 %v347_v38  ;;  %v342_v44 = vld [vmem:[#allocation7 + $0xa0] sm:$0xff]  ;;  %v365_v21 = vld [vmem:[#allocation7 + $0x158] sm:$0xff] }
  0x44   : > { %v343_v42 = vld [vmem:[#allocation7 + $0xa8] sm:$0xff]  ;;  %v410_v45 = vld [vmem:[#allocation7 + $0x2c0] sm:$0xff]  ;;  %469 = vmatpush.msra.mxu0 %v346_v40  ;;  %488 = vmatpush.msra.mxu1 %v414_v41  ;;  %v433_v22 = vld [vmem:[#allocation7 + $0x378] sm:$0xff] }
  0x45   : > { %v407_v43 = vld [vmem:[#allocation7 + $0x2a8] sm:$0xff]  ;;  %529 = vmatpush.msra.mxu3 %v411_v39  ;;  %510 = vmatpush.msra.mxu2 %v343_v42  ;;  %v338_v48 = vld [vmem:[#allocation7 + $0x80] sm:$0xff]  ;;  %v368_v23 = vld [vmem:[#allocation7 + $0x170] sm:$0xff] }
  0x46   : > { %v339_v46 = vld [vmem:[#allocation7 + $0x88] sm:$0xff]  ;;  %v406_v49 = vld [vmem:[#allocation7 + $0x2a0] sm:$0xff]  ;;  %470 = vmatpush.msra.mxu0 %v342_v44  ;;  %489 = vmatpush.msra.mxu1 %v410_v45  ;;  %v436_v24 = vld [vmem:[#allocation7 + $0x390] sm:$0xff] }
  0x47   : > { %v403_v47 = vld [vmem:[#allocation7 + $0x288] sm:$0xff]  ;;  %530 = vmatpush.msra.mxu3 %v407_v43  ;;  %511 = vmatpush.msra.mxu2 %v339_v46  ;;  %v334_v52 = vld [vmem:[#allocation7 + $0x60] sm:$0xff]  ;;  %v361_v25 = vld [vmem:[#allocation7 + $0x138] sm:$0xff] }
  0x48   : > { %v335_v50 = vld [vmem:[#allocation7 + $0x68] sm:$0xff]  ;;  %v402_v53 = vld [vmem:[#allocation7 + $0x280] sm:$0xff]  ;;  %471 = vmatpush.msra.mxu0 %v338_v48  ;;  %490 = vmatpush.msra.mxu1 %v406_v49  ;;  %v429_v26 = vld [vmem:[#allocation7 + $0x358] sm:$0xff] }
  0x49   : > { %v399_v51 = vld [vmem:[#allocation7 + $0x268] sm:$0xff]  ;;  %531 = vmatpush.msra.mxu3 %v403_v47  ;;  %512 = vmatpush.msra.mxu2 %v335_v50  ;;  %v330_v56 = vld [vmem:[#allocation7 + $0x40] sm:$0xff]  ;;  %v364_v27 = vld [vmem:[#allocation7 + $0x150] sm:$0xff] }
  0x4a   : > { %v331_v54 = vld [vmem:[#allocation7 + $0x48] sm:$0xff]  ;;  %v398_v57 = vld [vmem:[#allocation7 + $0x260] sm:$0xff]  ;;  %472 = vmatpush.msra.mxu0 %v334_v52  ;;  %491 = vmatpush.msra.mxu1 %v402_v53  ;;  %v432_v28 = vld [vmem:[#allocation7 + $0x370] sm:$0xff] }
  0x4b   : > { %v395_v55 = vld [vmem:[#allocation7 + $0x248] sm:$0xff]  ;;  %532 = vmatpush.msra.mxu3 %v399_v51  ;;  %513 = vmatpush.msra.mxu2 %v331_v54  ;;  %v326_v60 = vld [vmem:[#allocation7 + $0x20] sm:$0xff]  ;;  %v357_v29 = vld [vmem:[#allocation7 + $0x118] sm:$0xff] }
  0x4c   : > { %v327_v58 = vld [vmem:[#allocation7 + $0x28] sm:$0xff]  ;;  %v394_v61 = vld [vmem:[#allocation7 + $0x240] sm:$0xff]  ;;  %473 = vmatpush.msra.mxu0 %v330_v56  ;;  %492 = vmatpush.msra.mxu1 %v398_v57  ;;  %v425_v30 = vld [vmem:[#allocation7 + $0x338] sm:$0xff] }
  0x4d   : > { %v391_v59 = vld [vmem:[#allocation7 + $0x228] sm:$0xff]  ;;  %533 = vmatpush.msra.mxu3 %v395_v55  ;;  %514 = vmatpush.msra.mxu2 %v327_v58  ;;  %v322_v1 = vld [vmem:[#allocation7] sm:$0xff]  ;;  %v360_v31 = vld [vmem:[#allocation7 + $0x130] sm:$0xff] }
  0x4e   : > { %v323_v62 = vld [vmem:[#allocation7 + $0x8] sm:$0xff]  ;;  %474 = vmatpush.msra.mxu0 %v326_v60  ;;  %493 = vmatpush.msra.mxu1 %v394_v61  ;;  %v390_v2 = vld [vmem:[#allocation7 + $0x220] sm:$0xff]  ;;  %v428_v32 = vld [vmem:[#allocation7 + $0x350] sm:$0xff] }
  0x4f   : > { %v387_v63 = vld [vmem:[#allocation7 + $0x208] sm:$0xff]  ;;  %534 = vmatpush.msra.mxu3 %v391_v59  ;;  %515 = vmatpush.msra.mxu2 %v323_v62  ;;  %v386_v6 = vld [vmem:[#allocation7 + $0x200] sm:$0xff]  ;;  %v353_v33 = vld [vmem:[#allocation7 + $0xf8] sm:$0xff] }
  0x50   : > { %475 = vmatpush.msra.mxu0 %v322_v1  ;;  %494 = vmatpush.msra.mxu1 %v390_v2  ;;  %v421_v34 = vld [vmem:[#allocation7 + $0x318] sm:$0xff]  ;;  %v356_v35 = vld [vmem:[#allocation7 + $0x110] sm:$0xff] }
  0x51   : > { %535 = vmatpush.msra.mxu3 %v387_v63  ;;  %580 = vmatpush.msrb.mxu2 %v385_v0  ;;  %v424_v36 = vld [vmem:[#allocation7 + $0x330] sm:$0xff]  ;;  %v349_v37 = vld [vmem:[#allocation7 + $0xd8] sm:$0xff] }
  0x52   : > { %540 = vmatpush.msrb.mxu0 %v384_v5  ;;  %495 = vmatpush.msra.mxu1 %v386_v6  ;;  %v417_v38 = vld [vmem:[#allocation7 + $0x2f8] sm:$0xff]  ;;  %v352_v39 = vld [vmem:[#allocation7 + $0xf0] sm:$0xff]  ;;  %v749_v5 = vld [vmem:[#allocation7 + $0x5e0] sm:$0xff] }
  0x53   : > { %600 = vmatpush.msrb.mxu3 %v449_v3  ;;  %581 = vmatpush.msrb.mxu2 %v381_v4  ;;  %v420_v40 = vld [vmem:[#allocation7 + $0x310] sm:$0xff]  ;;  %v345_v41 = vld [vmem:[#allocation7 + $0xb8] sm:$0xff]  ;;  %v750_v6 = vld [vmem:[#allocation7 + $0x5e8] sm:$0xff] }
  0x54   : > { %541 = vmatpush.msrb.mxu0 %v380_v9  ;;  %560 = vmatpush.msrb.mxu1 %v448_v10  ;;  %v413_v42 = vld [vmem:[#allocation7 + $0x2d8] sm:$0xff]  ;;  %v348_v43 = vld [vmem:[#allocation7 + $0xd0] sm:$0xff]  ;;  %v746_v9 = vld [vmem:[#allocation7 + $0x5c8] sm:$0xff] }
  0x55   : > { %601 = vmatpush.msrb.mxu3 %v445_v7  ;;  %582 = vmatpush.msrb.mxu2 %v377_v8  ;;  %v416_v44 = vld [vmem:[#allocation7 + $0x2f0] sm:$0xff]  ;;  %v341_v45 = vld [vmem:[#allocation7 + $0x98] sm:$0xff]  ;;  %v745_v7 = vld [vmem:[#allocation7 + $0x5c0] sm:$0xff] }
  0x56   : > { %542 = vmatpush.msrb.mxu0 %v376_v13  ;;  %516 = vmatmul.f32.vlgmr.msra.gmra.mxu2 %v1451_v14  ;;  %v409_v46 = vld [vmem:[#allocation7 + $0x2b8] sm:$0xff]  ;;  %v344_v47 = vld [vmem:[#allocation7 + $0xb0] sm:$0xff]  ;;  %v813_v8 = vld [vmem:[#allocation7 + $0x7e0] sm:$0xff] }
  0x57   : > { %602 = vmatpush.msrb.mxu3 %v441_v11  ;;  %583 = vmatpush.msrb.mxu2 %v373_v12  ;;  %v412_v48 = vld [vmem:[#allocation7 + $0x2d0] sm:$0xff]  ;;  %v337_v49 = vld [vmem:[#allocation7 + $0x78] sm:$0xff]  ;;  %v814_v10 = vld [vmem:[#allocation7 + $0x7e8] sm:$0xff] }
  0x58   : > { %561 = vmatpush.msrb.mxu1 %v444_v15  ;;  %536 = vmatmul.f32.vlgmr.msra.gmra.mxu3 %v1453_v18  ;;  %v405_v50 = vld [vmem:[#allocation7 + $0x298] sm:$0xff]  ;;  %v340_v51 = vld [vmem:[#allocation7 + $0x90] sm:$0xff]  ;;  %v741_v11 = vld [vmem:[#allocation7 + $0x5a0] sm:$0xff] }
  0x59   : > { %584 = vmatpush.msrb.mxu2 %v369_v16  ;;  %603 = vmatpush.msrb.mxu3 %v437_v17  ;;  %v408_v52 = vld [vmem:[#allocation7 + $0x2b0] sm:$0xff]  ;;  %v333_v53 = vld [vmem:[#allocation7 + $0x58] sm:$0xff]  ;;  %v809_v12 = vld [vmem:[#allocation7 + $0x7c0] sm:$0xff] }
  0x5a   : > { %543 = vmatpush.msrb.mxu0 %v372_v19  ;;  %562 = vmatpush.msrb.mxu1 %v440_v20  ;;  %v401_v54 = vld [vmem:[#allocation7 + $0x278] sm:$0xff]  ;;  %v336_v55 = vld [vmem:[#allocation7 + $0x70] sm:$0xff]  ;;  %v742_v13 = vld [vmem:[#allocation7 + $0x5a8] sm:$0xff] }
  0x5b   : > { %585 = vmatpush.msrb.mxu2 %v365_v21  ;;  %604 = vmatpush.msrb.mxu3 %v433_v22  ;;  %v404_v56 = vld [vmem:[#allocation7 + $0x290] sm:$0xff]  ;;  %v329_v57 = vld [vmem:[#allocation7 + $0x38] sm:$0xff]  ;;  %v737_v15 = vld [vmem:[#allocation7 + $0x580] sm:$0xff] }
  0x5c   : > { %544 = vmatpush.msrb.mxu0 %v368_v23  ;;  %563 = vmatpush.msrb.mxu1 %v436_v24  ;;  %v397_v58 = vld [vmem:[#allocation7 + $0x258] sm:$0xff]  ;;  %v332_v59 = vld [vmem:[#allocation7 + $0x50] sm:$0xff]  ;;  %v805_v16 = vld [vmem:[#allocation7 + $0x7a0] sm:$0xff] }
  0x5d   : > { %586 = vmatpush.msrb.mxu2 %v361_v25  ;;  %605 = vmatpush.msrb.mxu3 %v429_v26  ;;  %v400_v60 = vld [vmem:[#allocation7 + $0x270] sm:$0xff]  ;;  %v325_v61 = vld [vmem:[#allocation7 + $0x18] sm:$0xff]  ;;  %v738_v17 = vld [vmem:[#allocation7 + $0x588] sm:$0xff] }
  0x5e   : > { %476 = vmatmul.f32.vlgmr.msra.gmra.mxu0 %v1451_v14  ;;  %564 = vmatpush.msrb.mxu1 %v432_v28  ;;  %v393_v62 = vld [vmem:[#allocation7 + $0x238] sm:$0xff]  ;;  %v328_v63 = vld [vmem:[#allocation7 + $0x30] sm:$0xff]  ;;  %v733_v19 = vld [vmem:[#allocation7 + $0x560] sm:$0xff] }
  0x5f   : > { %545 = vmatpush.msrb.mxu0 %v364_v27  ;;  %587 = vmatpush.msrb.mxu2 %v357_v29  ;;  %v396_v0 = vld [vmem:[#allocation7 + $0x250] sm:$0xff]  ;;  %v389_v1 = vld [vmem:[#allocation7 + $0x218] sm:$0xff]  ;;  %v801_v20 = vld [vmem:[#allocation7 + $0x780] sm:$0xff] }
  0x60   : > { %606 = vmatpush.msrb.mxu3 %v425_v30  ;;  %496 = vmatmul.f32.vlgmr.msra.gmra.mxu1 %v1453_v18  ;;  %v324_v2 = vld [vmem:[#allocation7 + $0x10] sm:$0xff]  ;;  %v734_v21 = vld [vmem:[#allocation7 + $0x568] sm:$0xff]  ;;  %v729_v23 = vld [vmem:[#allocation7 + $0x540] sm:$0xff] }
  0x61   : > { %546 = vmatpush.msrb.mxu0 %v360_v31  ;;  %565 = vmatpush.msrb.mxu1 %v428_v32  ;;  %v392_v3 = vld [vmem:[#allocation7 + $0x230] sm:$0xff]  ;;  %v802_v22 = vld [vmem:[#allocation7 + $0x788] sm:$0xff]  ;;  %v797_v24 = vld [vmem:[#allocation7 + $0x760] sm:$0xff] }
  0x62   : > { %588 = vmatpush.msrb.mxu2 %v353_v33  ;;  %607 = vmatpush.msrb.mxu3 %v421_v34  ;;  %v388_v4 = vld [vmem:[#allocation7 + $0x210] sm:$0xff]  ;;  %v730_v25 = vld [vmem:[#allocation7 + $0x548] sm:$0xff]  ;;  %v725_v27 = vld [vmem:[#allocation7 + $0x520] sm:$0xff] }
  0x63   : > { %547 = vmatpush.msrb.mxu0 %v356_v35  ;;  %566 = vmatpush.msrb.mxu1 %v424_v36  ;;  %v798_v26 = vld [vmem:[#allocation7 + $0x768] sm:$0xff]  ;;  %v793_v28 = vld [vmem:[#allocation7 + $0x740] sm:$0xff] }
  0x64   : > { %589 = vmatpush.msrb.mxu2 %v349_v37  ;;  %608 = vmatpush.msrb.mxu3 %v417_v38  ;;  %v726_v29 = vld [vmem:[#allocation7 + $0x528] sm:$0xff]  ;;  %v721_v31 = vld [vmem:[#allocation7 + $0x500] sm:$0xff] }
  0x65   : > { %548 = vmatpush.msrb.mxu0 %v352_v39  ;;  %567 = vmatpush.msrb.mxu1 %v420_v40  ;;  %v794_v30 = vld [vmem:[#allocation7 + $0x748] sm:$0xff]  ;;  %v789_v32 = vld [vmem:[#allocation7 + $0x720] sm:$0xff] }
  0x66   : > { %590 = vmatpush.msrb.mxu2 %v345_v41  ;;  %609 = vmatpush.msrb.mxu3 %v413_v42  ;;  %v722_v33 = vld [vmem:[#allocation7 + $0x508] sm:$0xff]  ;;  %v717_v35 = vld [vmem:[#allocation7 + $0x4e0] sm:$0xff]  ;;  %v1466_v42 = vld [vmem:[%s1642_s4] sm:$0xf] }
  0x67   : > { %549 = vmatpush.msrb.mxu0 %v348_v43  ;;  %568 = vmatpush.msrb.mxu1 %v416_v44  ;;  %v790_v34 = vld [vmem:[#allocation7 + $0x728] sm:$0xff]  ;;  %v785_v36 = vld [vmem:[#allocation7 + $0x700] sm:$0xff] }
  0x68   : > { %591 = vmatpush.msrb.mxu2 %v341_v45  ;;  %610 = vmatpush.msrb.mxu3 %v409_v46  ;;  %v718_v37 = vld [vmem:[#allocation7 + $0x4e8] sm:$0xff]  ;;  %v713_v39 = vld [vmem:[#allocation7 + $0x4c0] sm:$0xff] }
  0x69   : > { %550 = vmatpush.msrb.mxu0 %v344_v47  ;;  %569 = vmatpush.msrb.mxu1 %v412_v48  ;;  %v786_v38 = vld [vmem:[#allocation7 + $0x708] sm:$0xff]  ;;  %v781_v40 = vld [vmem:[#allocation7 + $0x6e0] sm:$0xff] }
  0x6a   : > { %592 = vmatpush.msrb.mxu2 %v337_v49  ;;  %611 = vmatpush.msrb.mxu3 %v405_v50  ;;  %v714_v41 = vld [vmem:[#allocation7 + $0x4c8] sm:$0xff]  ;;  %v709_v44 = vld [vmem:[#allocation7 + $0x4a0] sm:$0xff] }
  0x6b   : > { %551 = vmatpush.msrb.mxu0 %v340_v51  ;;  %570 = vmatpush.msrb.mxu1 %v408_v52  ;;  %v782_v43 = vld [vmem:[#allocation7 + $0x6e8] sm:$0xff]  ;;  %v777_v45 = vld [vmem:[#allocation7 + $0x6c0] sm:$0xff]  ;;  %v452_v51 = vperm.slane %v1466_v42, 0  ;;  %v453_v52 = vperm.slane %v1466_v42, 1 }
  0x6c   : > { %593 = vmatpush.msrb.mxu2 %v333_v53  ;;  %612 = vmatpush.msrb.mxu3 %v401_v54  ;;  %v710_v46 = vld [vmem:[#allocation7 + $0x4a8] sm:$0xff]  ;;  %v705_v48 = vld [vmem:[#allocation7 + $0x480] sm:$0xff] }
  0x6d   : > { %552 = vmatpush.msrb.mxu0 %v336_v55  ;;  %571 = vmatpush.msrb.mxu1 %v404_v56  ;;  %v778_v47 = vld [vmem:[#allocation7 + $0x6c8] sm:$0xff]  ;;  %v773_v49 = vld [vmem:[#allocation7 + $0x6a0] sm:$0xff] }
  0x6e   : > { %594 = vmatpush.msrb.mxu2 %v329_v57  ;;  %613 = vmatpush.msrb.mxu3 %v397_v58  ;;  %v706_v50 = vld [vmem:[#allocation7 + $0x488] sm:$0xff]  ;;  %v701_v54 = vld [vmem:[#allocation7 + $0x460] sm:$0xff] }
  0x6f   : > { %553 = vmatpush.msrb.mxu0 %v332_v59  ;;  %572 = vmatpush.msrb.mxu1 %v400_v60  ;;  %v774_v53 = vld [vmem:[#allocation7 + $0x6a8] sm:$0xff]  ;;  %v769_v55 = vld [vmem:[#allocation7 + $0x680] sm:$0xff] }
  0x70   : > { %595 = vmatpush.msrb.mxu2 %v325_v61  ;;  %614 = vmatpush.msrb.mxu3 %v393_v62  ;;  %v702_v56 = vld [vmem:[#allocation7 + $0x468] sm:$0xff]  ;;  %v697_v60 = vld [vmem:[#allocation7 + $0x440] sm:$0xff] }
  0x71   : > { %554 = vmatpush.msrb.mxu0 %v328_v63  ;;  %573 = vmatpush.msrb.mxu1 %v396_v0  ;;  %v770_v57 = vld [vmem:[#allocation7 + $0x688] sm:$0xff]  ;;  %v765_v61 = vld [vmem:[#allocation7 + $0x660] sm:$0xff] }
  0x72   : > { %596 = vmatmul.f32.vlgmr.msrb.gmra.mxu2 %v1451_v14  ;;  %615 = vmatpush.msrb.mxu3 %v389_v1  ;;  %v698_v62 = vld [vmem:[#allocation7 + $0x448] sm:$0xff] }
  0x73   : > { %555 = vmatpush.msrb.mxu0 %v324_v2  ;;  %574 = vmatpush.msrb.mxu1 %v392_v3  ;;  %v766_v1 = vld [vmem:[#allocation7 + $0x668] sm:$0xff]  ;;  %v693_v3 = vld [vmem:[#allocation7 + $0x420] sm:$0xff] }
  0x74   : > { %616 = vmatmul.f32.vlgmr.msrb.gmra.mxu3 %v1453_v18  ;;  %556 = vmatmul.f32.vlgmr.msrb.gmra.mxu0 %v1451_v14  ;;  %v810_v14 = vld [vmem:[#allocation7 + $0x7c8] sm:$0xff] }
  0x75   : > { %575 = vmatpush.msrb.mxu1 %v388_v4  ;;  %828 = vmatpush.msra.mxu0 %v749_v5  ;;  %v761_v4 = vld [vmem:[#allocation7 + $0x640] sm:$0xff]  ;;  %v694_v5 = vld [vmem:[#allocation7 + $0x428] sm:$0xff] }
  0x76   : > { %576 = vmatmul.f32.vlgmr.msrb.gmra.mxu1 %v1453_v18  ;;  %868 = vmatpush.msra.mxu2 %v750_v6  ;;  %v806_v18 = vld [vmem:[#allocation7 + $0x7a8] sm:$0xff] }
  0x77   : > { %829 = vmatpush.msra.mxu0 %v745_v7  ;;  %848 = vmatpush.msra.mxu1 %v813_v8  ;;  %v762_v8 = vld [vmem:[#allocation7 + $0x648] sm:$0xff] }
  0x78   : > { %869 = vmatpush.msra.mxu2 %v746_v9  ;;  %888 = vmatpush.msra.mxu3 %v814_v10  ;;  %v689_v10 = vld [vmem:[#allocation7 + $0x400] sm:$0xff] }
  0x79   : > { %830 = vmatpush.msra.mxu0 %v741_v11  ;;  %849 = vmatpush.msra.mxu1 %v809_v12  ;;  %v757_v11 = vld [vmem:[#allocation7 + $0x620] sm:$0xff]  ;;  %v690_v12 = vld [vmem:[#allocation7 + $0x408] sm:$0xff] }
  0x7a   : > { %870 = vmatpush.msra.mxu2 %v742_v13  ;;  %889 = vmatpush.msra.mxu3 %v810_v14  ;;  %v758_v14 = vld [vmem:[#allocation7 + $0x628] sm:$0xff] }
  0x7b   : > { %831 = vmatpush.msra.mxu0 %v737_v15  ;;  %850 = vmatpush.msra.mxu1 %v805_v16  ;;  %v751_v15 = vld [vmem:[#allocation7 + $0x5f0] sm:$0xff]  ;;  %v752_v16 = vld [vmem:[#allocation7 + $0x5f8] sm:$0xff] }
  0x7c   : > { %871 = vmatpush.msra.mxu2 %v738_v17  ;;  %890 = vmatpush.msra.mxu3 %v806_v18  ;;  %v753_v18 = vld [vmem:[#allocation7 + $0x600] sm:$0xff] }
  0x7d   : > { %832 = vmatpush.msra.mxu0 %v733_v19  ;;  %851 = vmatpush.msra.mxu1 %v801_v20  ;;  %v754_v19 = vld [vmem:[#allocation7 + $0x608] sm:$0xff]  ;;  %v747_v20 = vld [vmem:[#allocation7 + $0x5d0] sm:$0xff] }
  0x7e   : > { %872 = vmatpush.msra.mxu2 %v734_v21  ;;  %891 = vmatpush.msra.mxu3 %v802_v22  ;;  %v815_v21 = vld [vmem:[#allocation7 + $0x7f0] sm:$0xff]  ;;  %v748_v22 = vld [vmem:[#allocation7 + $0x5d8] sm:$0xff] }
  0x7f   : > { %833 = vmatpush.msra.mxu0 %v729_v23  ;;  %852 = vmatpush.msra.mxu1 %v797_v24  ;;  %v816_v23 = vld [vmem:[#allocation7 + $0x7f8] sm:$0xff]  ;;  %v743_v24 = vld [vmem:[#allocation7 + $0x5b0] sm:$0xff] }
  0x80   : > { %873 = vmatpush.msra.mxu2 %v730_v25  ;;  %892 = vmatpush.msra.mxu3 %v798_v26  ;;  %v811_v25 = vld [vmem:[#allocation7 + $0x7d0] sm:$0xff]  ;;  %v744_v26 = vld [vmem:[#allocation7 + $0x5b8] sm:$0xff] }
  0x81   : > { %834 = vmatpush.msra.mxu0 %v725_v27  ;;  %853 = vmatpush.msra.mxu1 %v793_v28  ;;  %v812_v27 = vld [vmem:[#allocation7 + $0x7d8] sm:$0xff]  ;;  %v739_v28 = vld [vmem:[#allocation7 + $0x590] sm:$0xff] }
  0x82   : > { %874 = vmatpush.msra.mxu2 %v726_v29  ;;  %893 = vmatpush.msra.mxu3 %v794_v30  ;;  %v807_v29 = vld [vmem:[#allocation7 + $0x7b0] sm:$0xff]  ;;  %v740_v30 = vld [vmem:[#allocation7 + $0x598] sm:$0xff] }
  0x83   : > { %835 = vmatpush.msra.mxu0 %v721_v31  ;;  %854 = vmatpush.msra.mxu1 %v789_v32  ;;  %v808_v31 = vld [vmem:[#allocation7 + $0x7b8] sm:$0xff] }
  0x84   : > { %875 = vmatpush.msra.mxu2 %v722_v33  ;;  %894 = vmatpush.msra.mxu3 %v790_v34  ;;  %v735_v33 = vld [vmem:[#allocation7 + $0x570] sm:$0xff] }
  0x85   : > { %836 = vmatpush.msra.mxu0 %v717_v35  ;;  %855 = vmatpush.msra.mxu1 %v785_v36  ;;  %v803_v34 = vld [vmem:[#allocation7 + $0x790] sm:$0xff]  ;;  %v736_v35 = vld [vmem:[#allocation7 + $0x578] sm:$0xff] }
  0x86   : > { %876 = vmatpush.msra.mxu2 %v718_v37  ;;  %895 = vmatpush.msra.mxu3 %v786_v38  ;;  %v804_v38 = vld [vmem:[#allocation7 + $0x798] sm:$0xff] }
  0x87   : > { %837 = vmatpush.msra.mxu0 %v713_v39  ;;  %856 = vmatpush.msra.mxu1 %v781_v40  ;;  %v731_v40 = vld [vmem:[#allocation7 + $0x550] sm:$0xff] }
  0x88   : > { %877 = vmatpush.msra.mxu2 %v714_v41  ;;  %896 = vmatpush.msra.mxu3 %v782_v43  ;;  %v799_v41 = vld [vmem:[#allocation7 + $0x770] sm:$0xff]  ;;  %v732_v43 = vld [vmem:[#allocation7 + $0x558] sm:$0xff] }
  0x89   : > { %838 = vmatpush.msra.mxu0 %v709_v44  ;;  %857 = vmatpush.msra.mxu1 %v777_v45  ;;  %v800_v44 = vld [vmem:[#allocation7 + $0x778] sm:$0xff]  ;;  %v727_v45 = vld [vmem:[#allocation7 + $0x530] sm:$0xff] }
  0x8a   : > { %878 = vmatpush.msra.mxu2 %v710_v46  ;;  %897 = vmatpush.msra.mxu3 %v778_v47  ;;  %v795_v46 = vld [vmem:[#allocation7 + $0x750] sm:$0xff]  ;;  %v728_v47 = vld [vmem:[#allocation7 + $0x538] sm:$0xff] }
  0x8b   : > { %839 = vmatpush.msra.mxu0 %v705_v48  ;;  %858 = vmatpush.msra.mxu1 %v773_v49  ;;  %v796_v48 = vld [vmem:[#allocation7 + $0x758] sm:$0xff]  ;;  %v723_v49 = vld [vmem:[#allocation7 + $0x510] sm:$0xff] }
  0x8c   : > { %879 = vmatpush.msra.mxu2 %v706_v50  ;;  %898 = vmatpush.msra.mxu3 %v774_v53  ;;  %v791_v50 = vld [vmem:[#allocation7 + $0x730] sm:$0xff]  ;;  %v792_v53 = vld [vmem:[#allocation7 + $0x738] sm:$0xff] }
  0x8d   : > { %840 = vmatpush.msra.mxu0 %v701_v54  ;;  %859 = vmatpush.msra.mxu1 %v769_v55  ;;  %v719_v54 = vld [vmem:[#allocation7 + $0x4f0] sm:$0xff] }
  0x8e   : > { %880 = vmatpush.msra.mxu2 %v702_v56  ;;  %899 = vmatpush.msra.mxu3 %v770_v57  ;;  %v787_v55 = vld [vmem:[#allocation7 + $0x710] sm:$0xff]  ;;  %v720_v56 = vld [vmem:[#allocation7 + $0x4f8] sm:$0xff] }
  0x8f   : > { %841 = vmatpush.msra.mxu0 %v697_v60  ;;  %860 = vmatpush.msra.mxu1 %v765_v61  ;;  %v783_v60 = vld [vmem:[#allocation7 + $0x6f0] sm:$0xff] }
  0x90   : > { %881 = vmatpush.msra.mxu2 %v698_v62  ;;  %900 = vmatpush.msra.mxu3 %v766_v1  ;;  %v455_v1 = vperm.slane %v1466_v42, 3 }
  0x91   : > { %842 = vmatpush.msra.mxu0 %v693_v3  ;;  %861 = vmatpush.msra.mxu1 %v761_v4  ;;  %v784_v3 = vld [vmem:[#allocation7 + $0x6f8] sm:$0xff] }
  0x92   : > { %882 = vmatpush.msra.mxu2 %v694_v5  ;;  %901 = vmatpush.msra.mxu3 %v762_v8  ;;  %v779_v8 = vld [vmem:[#allocation7 + $0x6d0] sm:$0xff] }
  0x93   : > { %843 = vmatpush.msra.mxu0 %v689_v10  ;;  %862 = vmatpush.msra.mxu1 %v757_v11  ;;  %v712_v11 = vld [vmem:[#allocation7 + $0x4b8] sm:$0xff] }
  0x94   : > { %883 = vmatpush.msra.mxu2 %v690_v12  ;;  %902 = vmatpush.msra.mxu3 %v758_v14  ;;  %v780_v12 = vld [vmem:[#allocation7 + $0x6d8] sm:$0xff] }
  0x95   : > { %908 = vmatpush.msrb.mxu0 %v751_v15  ;;  %863 = vmatpush.msra.mxu1 %v753_v18  ;;  %v775_v18 = vld [vmem:[#allocation7 + $0x6b0] sm:$0xff] }
  0x96   : > { %948 = vmatpush.msrb.mxu2 %v752_v16  ;;  %903 = vmatpush.msra.mxu3 %v754_v19 }
  0x97   : > { %909 = vmatpush.msrb.mxu0 %v747_v20  ;;  %928 = vmatpush.msrb.mxu1 %v815_v21  ;;  %v1065_v20 = vld [vmem:[%s1643_s5 + $0x50] sm:$0xff] }
  0x98   : > { %949 = vmatpush.msrb.mxu2 %v748_v22  ;;  %968 = vmatpush.msrb.mxu3 %v816_v23  ;;  %v708_v22 = vld [vmem:[#allocation7 + $0x498] sm:$0xff] }
  0x99   : > { %910 = vmatpush.msrb.mxu0 %v743_v24  ;;  %929 = vmatpush.msrb.mxu1 %v811_v25  ;;  %v776_v23 = vld [vmem:[#allocation7 + $0x6b8] sm:$0xff] }
  0x9a   : > { %950 = vmatpush.msrb.mxu2 %v744_v26  ;;  %969 = vmatpush.msrb.mxu3 %v812_v27 }
  0x9b   : > { %911 = vmatpush.msrb.mxu0 %v739_v28  ;;  %930 = vmatpush.msrb.mxu1 %v807_v29 }
  0x9c   : > { %951 = vmatpush.msrb.mxu2 %v740_v30  ;;  %970 = vmatpush.msrb.mxu3 %v808_v31  ;;  %v1062_v30 = vld [vmem:[%s1643_s5 + $0x38] sm:$0xff] }
  0x9d   : > { %912 = vmatpush.msrb.mxu0 %v735_v33  ;;  %931 = vmatpush.msrb.mxu1 %v803_v34  ;;  %v771_v33 = vld [vmem:[#allocation7 + $0x690] sm:$0xff]  ;;  %v704_v34 = vld [vmem:[#allocation7 + $0x478] sm:$0xff] }
  0x9e   : > { %952 = vmatpush.msrb.mxu2 %v736_v35  ;;  %971 = vmatpush.msrb.mxu3 %v804_v38  ;;  %v772_v38 = vld [vmem:[#allocation7 + $0x698] sm:$0xff] }
  0x9f   : > { %913 = vmatpush.msrb.mxu0 %v731_v40  ;;  %932 = vmatpush.msrb.mxu1 %v799_v41 }
  0xa0   : > { %953 = vmatpush.msrb.mxu2 %v732_v43  ;;  %972 = vmatpush.msrb.mxu3 %v800_v44  ;;  %v699_v43 = vld [vmem:[#allocation7 + $0x450] sm:$0xff] }
  0xa1   : > { %914 = vmatpush.msrb.mxu0 %v727_v45  ;;  %933 = vmatpush.msrb.mxu1 %v795_v46  ;;  %v767_v44 = vld [vmem:[#allocation7 + $0x670] sm:$0xff] }
  0xa2   : > { %954 = vmatpush.msrb.mxu2 %v728_v47  ;;  %973 = vmatpush.msrb.mxu3 %v796_v48  ;;  %v700_v47 = vld [vmem:[#allocation7 + $0x458] sm:$0xff] }
  0xa3   : > { %915 = vmatpush.msrb.mxu0 %v723_v49  ;;  %934 = vmatpush.msrb.mxu1 %v791_v50  ;;  %v768_v48 = vld [vmem:[#allocation7 + $0x678] sm:$0xff] }
  0xa4   : > { %974 = vmatpush.msrb.mxu3 %v792_v53 }
  0xa5   : > { %916 = vmatpush.msrb.mxu0 %v719_v54  ;;  %935 = vmatpush.msrb.mxu1 %v787_v55  ;;  %v696_v54 = vld [vmem:[#allocation7 + $0x438] sm:$0xff] }
  0xa6   : > { %v764_v55 = vld [vmem:[#allocation7 + $0x658] sm:$0xff] }
  0xa7   : > { %936 = vmatpush.msrb.mxu1 %v783_v60  ;;  %v760_v60 = vld [vmem:[#allocation7 + $0x638] sm:$0xff] }
  0xa9   : > { %937 = vmatpush.msrb.mxu1 %v779_v8 }
  0xab   : > { %938 = vmatpush.msrb.mxu1 %v775_v18 }
  0xad   : > { %939 = vmatpush.msrb.mxu1 %v771_v33  ;;  %v1061_v33 = vld [vmem:[%s1643_s5 + $0x30] sm:$0xff] }
  0xaf   : > { %940 = vmatpush.msrb.mxu1 %v767_v44 }
  0xd9   : > { %v517_v59 = vpop.f32.mrf.mxu2 }
  0xda   : > { %v518_v0 = vadd.f32 %v517_v59, %v453_v52  ;;  %v454_v52 = vperm.slane %v1466_v42, 2  ;;  %v715_v59 = vld [vmem:[#allocation7 + $0x4d0] sm:$0xff] }
  0xdb   : > { %v477_v58 = vpop.f32.mrf.mxu0  ;;  %v537_v2 = vpop.f32.mrf.mxu3  ;;  %917 = vmatpush.msrb.mxu0 %v715_v59  ;;  %v692_v59 = vld [vmem:[#allocation7 + $0x418] sm:$0xff] }
  0xdc   : > { %v478_v63 = vadd.f32 %v477_v58, %v452_v51  ;;  %v538_v7 = vadd.f32 %v537_v2, %v518_v0  ;;  %v724_v51 = vld [vmem:[#allocation7 + $0x518] sm:$0xff] }
  0xdd   : > { %v497_v6 = vpop.f32.mrf.mxu1  ;;  %955 = vmatpush.msrb.mxu2 %v724_v51  ;;  %v788_v58 = vld [vmem:[#allocation7 + $0x718] sm:$0xff]  ;;  %v695_v51 = vld [vmem:[#allocation7 + $0x430] sm:$0xff] }
  0xde   : > { %v498_v9 = vadd.f32 %v497_v6, %v478_v63  ;;  %v1232_v13 = vmul.f32 -1.442695, %v538_v7  ;;  %v716_v2 = vld [vmem:[#allocation7 + $0x4d8] sm:$0xff]  ;;  %975 = vmatpush.msrb.mxu3 %v788_v58  ;;  %v711_v7 = vld [vmem:[#allocation7 + $0x4b0] sm:$0xff] }
  0xdf   : > { %956 = vmatpush.msrb.mxu2 %v720_v56  ;;  %918 = vmatpush.msrb.mxu0 %v711_v7  ;;  %v759_v58 = vld [vmem:[#allocation7 + $0x630] sm:$0xff] }
  0xe0   : > { %v1231_v17 = vmul.f32 -1.442695, %v498_v9  ;;  %1266 = vpow2.f32 %v1232_v13  ;;  %976 = vmatpush.msrb.mxu3 %v784_v3 }
  0xe1   : > { %957 = vmatpush.msrb.mxu2 %v716_v2 }
  0xe2   : > { %1268 = vpow2.f32 %v1231_v17  ;;  %v707_v17 = vld [vmem:[#allocation7 + $0x490] sm:$0xff]  ;;  %977 = vmatpush.msrb.mxu3 %v780_v12 }
  0xe3   : > { %958 = vmatpush.msrb.mxu2 %v712_v11  ;;  %919 = vmatpush.msrb.mxu0 %v707_v17  ;;  %v1067_v17 = vld [vmem:[%s1643_s5 + $0x60] sm:$0xff] }
  0xe4   : > { %978 = vmatpush.msrb.mxu3 %v776_v23 }
  0xe5   : > { %959 = vmatpush.msrb.mxu2 %v708_v22 }
  0xe6   : > { %v1267_v32 = vpop.eup %1266  ;;  %979 = vmatpush.msrb.mxu3 %v772_v38  ;;  %v1059_v38 = vld [vmem:[%s1643_s5 + $0x20] sm:$0xff] }
  0xe7   : > { %v1470_v37 = vadd.f32 1.0, %v1267_v32  ;;  %v703_v32 = vld [vmem:[#allocation7 + $0x470] sm:$0xff]  ;;  %960 = vmatpush.msrb.mxu2 %v704_v34 }
  0xe8   : > { %v1269_v36 = vpop.eup %1268  ;;  %920 = vmatpush.msrb.mxu0 %v703_v32  ;;  %980 = vmatpush.msrb.mxu3 %v768_v48 }
  0xe9   : > { %v1472_v39 = vadd.f32 1.0, %v1269_v36  ;;  %1270 = vrcp.f32 %v1470_v37  ;;  %vm648_vm0 = vweird.f32 %v1470_v37  ;;  %v654_v63 = vand.u32 2147483648, %v1470_v37  ;;  %961 = vmatpush.msrb.mxu2 %v700_v47  ;;  %v1056_v47 = vld [vmem:[%s1643_s5 + $0x8] sm:$0xff] }
  0xea   : > { %v652_v6 = vand.u32 2147483647, %v1470_v37  ;;  %921 = vmatpush.msrb.mxu0 %v699_v43  ;;  %981 = vmatpush.msrb.mxu3 %v764_v55 }
  0xeb   : > { %1272 = vrcp.f32 %v1472_v39  ;;  %vm629_vm2 = vweird.f32 %v1472_v39  ;;  %v635_v42 = vand.u32 2147483648, %v1472_v39  ;;  %v633_v15 = vand.u32 2147483647, %v1472_v39  ;;  %962 = vmatpush.msrb.mxu2 %v696_v54 }
  0xec   : > { %v655_v24 = vor.u32 1.1754944e-38, %v654_v63  ;;  %vm1513_vm6 = vcmp.eq.f32.partialorder %v652_v6, 8.507059e+37  ;;  %922 = vmatpush.msrb.mxu0 %v695_v51  ;;  %v756_v63 = vld [vmem:[#allocation7 + $0x618] sm:$0xff]  ;;  %982 = vmatpush.msrb.mxu3 %v760_v60 }
  0xed   : > { %v636_v28 = vor.u32 1.1754944e-38, %v635_v42  ;;  %vm1518_vm7 = vcmp.eq.f32.partialorder %v633_v15, 8.507059e+37  ;;  %963 = vmatpush.msrb.mxu2 %v692_v59  ;;  %v1068_v15 = vld [vmem:[%s1643_s5 + $0x68] sm:$0xff] }
  0xee   : > { %983 = vmatpush.msrb.mxu3 %v756_v63 }
  0xef   : > { %v1477_v57 = vpop.eup %1270 }
  0xf0   : > { %v644_v62 = vmul.f32 %v1477_v57, %v1470_v37  ;;  %vm649_vm1 = vweird.f32 %v1477_v57  ;;  %v678_v37 = vld [vmem:[#allocation3 + $0x8] sm:$0xff] }
  0xf1   : > { %v1479_v61 = vpop.eup %1272  ;;  %v557_v0 = vpop.f32.mrf.mxu0  ;;  %vm1499_vm4 = vmor %vm648_vm0, %vm649_vm1 }
  0xf2   : > { %v625_v4 = vmul.f32 %v1479_v61, %v1472_v39  ;;  %v558_v5 = vadd.f32 %v557_v0, %v454_v52  ;;  %v645_v9 = vsub.f32 1.0, %v644_v62  ;;  %vm630_vm3 = vweird.f32 %v1479_v61  ;;  %v687_v39 = vld [vmem:[#allocation2 + $0x8] sm:$0xff]  ;;  %v763_v52 = vld [vmem:[#allocation7 + $0x650] sm:$0xff] }
  0xf3   : > { %v577_v10 = vpop.f32.mrf.mxu1  ;;  %vm1508_vm5 = vmor %vm629_vm2, %vm630_vm3  ;;  %864 = vmatmul.f32.vlgmr.msra.gmra.mxu1 %v687_v39  ;;  %904 = vmatmul.f32.vlgmr.msra.gmra.mxu3 %v687_v39  ;;  %v755_v62 = vld [vmem:[#allocation7 + $0x610] sm:$0xff] }
  0xf4   : > { %v626_v13 = vsub.f32 1.0, %v625_v4  ;;  %v578_v14 = vadd.f32 %v577_v10, %v558_v5  ;;  %v646_v19 = vmul.f32 %v1477_v57, %v645_v9  ;;  %941 = vmatpush.msrb.mxu1 %v763_v52 }
  0xf5   : > { %v597_v16 = vpop.f32.mrf.mxu2 }
  0xf6   : > { %v598_v21 = vadd.f32 %v597_v16, %v455_v1  ;;  %v627_v25 = vmul.f32 %v1479_v61, %v626_v13  ;;  %1274 = vtanh.f32 %v578_v14  ;;  %v647_v29 = vadd.f32 %v1477_v57, %v646_v19  ;;  %942 = vmatpush.msrb.mxu1 %v759_v58  ;;  %v1070_v13 = vld [vmem:[%s1643_s5 + $0x78] sm:$0xff]  ;;  %v1069_v14 = vld [vmem:[%s1643_s5 + $0x70] sm:$0xff]  ;;  %v1234_v16 = vld [vmem:[%s1642_s4 + $0x4] sm:$0xf] }
  0xf7   : > { %v617_v27 = vpop.f32.mrf.mxu3  ;;  %v820_v18 = vperm.slane %v1234_v16, 0  ;;  %v1066_v19 = vld [vmem:[%s1643_s5 + $0x58] sm:$0xff]  ;;  %v821_v26 = vperm.slane %v1234_v16, 1 }
  0xf8   : > { %v618_v31 = vadd.f32 %v617_v27, %v598_v21  ;;  %v628_v35 = vadd.f32 %v1479_v61, %v627_v25  ;;  %v651_v40 = vsel %vm1499_vm4, %v1477_v57, %v647_v29  ;;  %v691_v57 = vld [vmem:[#allocation7 + $0x410] sm:$0xff]  ;;  %943 = vmatpush.msrb.mxu1 %v755_v62  ;;  %v1063_v27 = vld [vmem:[%s1643_s5 + $0x40] sm:$0xff] }
  0xf9   : > { %v656_v46 = vsel %vm1513_vm6, %v655_v24, %v651_v40  ;;  %923 = vmatpush.msrb.mxu0 %v691_v57  ;;  %v1064_v24 = vld [vmem:[%s1643_s5 + $0x48] sm:$0xff] }
  0xfa   : > { %v1233_v41 = vmul.f32 -1.442695, %v618_v31  ;;  %v632_v45 = vsel %vm1508_vm5, %v1479_v61, %v628_v35  ;;  %v679_v50 = vmul.f32 %v678_v37, %v656_v46  ;;  %v1060_v35 = vld [vmem:[%s1643_s5 + $0x28] sm:$0xff]  ;;  %v823_v37 = vperm.slane %v1234_v16, 3 }
  0xfb   : > { %v637_v49 = vsel %vm1518_vm7, %v636_v28, %v632_v45  ;;  %944 = vmatmul.f32.vlgmr.msrb.gmra.mxu1 %v687_v39  ;;  %984 = vmatmul.f32.vlgmr.msrb.gmra.mxu3 %v687_v39  ;;  %v1058_v39 = vld [vmem:[%s1643_s5 + $0x18] sm:$0xff] }
  0xfc   : > { %1276 = vpow2.f32 %v1233_v41  ;;  %v1275_v53 = vpop.eup %1274  ;;  %v1057_v41 = vld [vmem:[%s1643_s5 + $0x10] sm:$0xff] }
  0xfd   : > { %v680_v56 = vmul.f32 %v1275_v53, %v637_v49  ;;  %v1055_v49 = vld [vmem:[%s1643_s5] sm:$0xff]  ;;  %v822_v53 = vperm.slane %v1234_v16, 2 }
  0xff   : > { %v681_v61 = vadd.f32 %v680_v56, %v679_v50 }
 0x101   : > { %684 = vst [vmem:[#allocation3 + $0x8] sm:$0xff] %v681_v61 }
 0x102   : > { %v1277_v0 = vpop.eup %1276 }
 0x103   : > { %v662_v1 = vadd.f32 1.0, %v1277_v0 }
 0x105   : > { %1278 = vrcp.f32 %v662_v1  ;;  %v674_v5 = vand.u32 2147483648, %v662_v1  ;;  %v672_v7 = vand.u32 2147483647, %v662_v1  ;;  %vm668_vm9 = vweird.f32 %v662_v1 }
 0x106   : > { %1280 = vtanh.f32 %v681_v61 }
 0x107   : > { %v675_v9 = vor.u32 1.1754944e-38, %v674_v5  ;;  %vm673_vm11 = vcmp.eq.f32.partialorder %v672_v7, 8.507059e+37 }
 0x10b   : > { %v1279_v2 = vpop.eup %1278 }
 0x10c   : > { %v664_v3 = vmul.f32 %v1279_v2, %v662_v1  ;;  %vm669_vm8 = vweird.f32 %v1279_v2  ;;  %v1281_v42 = vpop.eup %1280 }
 0x10d   : > { %vm670_vm10 = vmor %vm668_vm9, %vm669_vm8 }
 0x10e   : > { %v665_v4 = vsub.f32 1.0, %v664_v3 }
 0x110   : > { %v666_v6 = vmul.f32 %v1279_v2, %v665_v4 }
 0x112   : > { %v667_v8 = vadd.f32 %v1279_v2, %v666_v6 }
 0x114   : > { %v671_v10 = vsel %vm670_vm10, %v1279_v2, %v667_v8 }
 0x115   : > { %v676_v11 = vsel %vm673_vm11, %v675_v9, %v671_v10 }
 0x116   : > { %v683_v12 = vmul.f32 %v1281_v42, %v676_v11 }
 0x118   : > { %685 = vst [vmem:[#allocation2] sm:$0xff] %v683_v12  ;;  %844 = vmatmul.f32.vlgmr.msra.gmra.mxu0 %v683_v12  ;;  %884 = vmatmul.f32.vlgmr.msra.gmra.mxu2 %v683_v12 }
 0x119   : > { %1075 = vmatpush.msra.mxu0 %v1070_v13 }
 0x11b   : > { %1076 = vmatpush.msra.mxu0 %v1069_v14  ;;  %v1047_v14 = vld [vmem:[#allocation3] sm:$0xff] }
 0x11d   : > { %1077 = vmatpush.msra.mxu0 %v1068_v15 }
 0x11f   : > { %1078 = vmatpush.msra.mxu0 %v1067_v17 }
 0x120   : > { %924 = vmatmul.f32.vlgmr.msrb.gmra.mxu0 %v683_v12  ;;  %964 = vmatmul.f32.vlgmr.msrb.gmra.mxu2 %v683_v12 }
 0x121   : > { %1079 = vmatpush.msra.mxu0 %v1066_v19 }
 0x123   : > { %1080 = vmatpush.msra.mxu0 %v1065_v20 }
 0x125   : > { %1081 = vmatpush.msra.mxu0 %v1064_v24 }
 0x127   : > { %1082 = vmatpush.msra.mxu0 %v1063_v27 }
 0x129   : > { %1083 = vmatpush.msra.mxu0 %v1062_v30 }
 0x12b   : > { %1084 = vmatpush.msra.mxu0 %v1061_v33 }
 0x12d   : > { %1085 = vmatpush.msra.mxu0 %v1060_v35  ;;  %v1096_v35 = vlaneseq }
 0x12f   : > { %1086 = vmatpush.msra.mxu0 %v1059_v38 }
 0x131   : > { %1087 = vmatpush.msra.mxu0 %v1058_v39 }
 0x133   : > { %1088 = vmatpush.msra.mxu0 %v1057_v41  ;;  %v1134_v41 = vld [vmem:[%s1645_s7 + $0x78] sm:$0xff] }
 0x134   : > { %1135 = vmatpush.msra.mxu1 %v1134_v41 }
 0x135   : > { %1089 = vmatpush.msra.mxu0 %v1056_v47  ;;  %v1129_v47 = vld [vmem:[%s1645_s7 + $0x50] sm:$0xff] }
 0x137   : > { %1090 = vmatpush.msra.mxu0 %v1055_v49  ;;  %v1127_v49 = vld [vmem:[%s1645_s7 + $0x40] sm:$0xff] }
 0x170   : > { %v865_v22 = vpop.f32.mrf.mxu1 }
 0x176   : > { %v905_v28 = vpop.f32.mrf.mxu3 }
 0x178   : > { %v945_v59 = vpop.f32.mrf.mxu1 }
 0x17e   : > { %v985_v45 = vpop.f32.mrf.mxu3 }
 0x195   : > { %v845_v21 = vpop.f32.mrf.mxu0 }
 0x196   : > { %v846_v23 = vadd.f32 %v845_v21, %v820_v18 }
 0x198   : > { %v866_v25 = vadd.f32 %v865_v22, %v846_v23 }
 0x19a   : > { %v1235_v29 = vmul.f32 -1.442695, %v866_v25 }
 0x19b   : > { %v885_v31 = vpop.f32.mrf.mxu2 }
 0x19c   : > { %1282 = vpow2.f32 %v1235_v29  ;;  %v886_v32 = vadd.f32 %v885_v31, %v821_v26 }
 0x19d   : > { %v925_v54 = vpop.f32.mrf.mxu0 }
 0x19e   : > { %v906_v34 = vadd.f32 %v905_v28, %v886_v32  ;;  %v926_v57 = vadd.f32 %v925_v54, %v822_v53  ;;  %v1265_v32 = vld [vmem:[%s1644_s6] ss:$0 sm:$0xff]  ;;  %v1122_v54 = vld [vmem:[%s1645_s7 + $0x18] sm:$0xff] }
 0x19f   : > { %v1123_v53 = vld [vmem:[%s1645_s7 + $0x20] sm:$0xff] }
 0x1a0   : > { %v1236_v36 = vmul.f32 -1.442695, %v906_v34  ;;  %v946_v63 = vadd.f32 %v945_v59, %v926_v57  ;;  %v1121_v59 = vld [vmem:[%s1645_s7 + $0x10] sm:$0xff] }
 0x1a2   : > { %v1283_v40 = vpop.eup %1282  ;;  %1284 = vpow2.f32 %v1236_v36  ;;  %v1097_v36 = vand.u32 127, %v1096_v35 }
 0x1a3   : > { %v991_v43 = vadd.f32 1.0, %v1283_v40  ;;  %v965_v44 = vpop.f32.mrf.mxu2 }
 0x1a4   : > { %v966_v46 = vadd.f32 %v965_v44, %v823_v37  ;;  %v1132_v44 = vld [vmem:[%s1645_s7 + $0x68] sm:$0xff] }
 0x1a5   : > { %1286 = vrcp.f32 %v991_v43  ;;  %v1003_v3 = vand.u32 2147483648, %v991_v43  ;;  %vm997_vm13 = vweird.f32 %v991_v43  ;;  %v1001_v5 = vand.u32 2147483647, %v991_v43 }
 0x1a6   : > { %v986_v48 = vadd.f32 %v985_v45, %v966_v46  ;;  %v1131_v45 = vld [vmem:[%s1645_s7 + $0x60] sm:$0xff]  ;;  %v1130_v46 = vld [vmem:[%s1645_s7 + $0x58] sm:$0xff] }
 0x1a7   : > { %v1004_v10 = vor.u32 1.1754944e-38, %v1003_v3  ;;  %vm1002_vm1 = vcmp.eq.f32.partialorder %v1001_v5, 8.507059e+37  ;;  %v1358_v3 = vmov 1.0  }
 0x1a8   : > { %v1285_v50 = vpop.eup %1284  ;;  %v1237_v51 = vmul.f32 -1.442695, %v986_v48  ;;  %v1128_v48 = vld [vmem:[%s1645_s7 + $0x48] sm:$0xff] }
 0x1a9   : > { %v1010_v52 = vadd.f32 1.0, %v1285_v50  ;;  %v1126_v50 = vld [vmem:[%s1645_s7 + $0x38] sm:$0xff] }
 0x1aa   : > { %1288 = vpow2.f32 %v1237_v51  ;;  %v1125_v51 = vld [vmem:[%s1645_s7 + $0x30] sm:$0xff] }
 0x1ab   : > { %v1287_v55 = vpop.eup %1286  ;;  %1290 = vrcp.f32 %v1010_v52  ;;  %v1022_v6 = vand.u32 2147483648, %v1010_v52  ;;  %v1020_v9 = vand.u32 2147483647, %v1010_v52  ;;  %vm1016_vm0 = vweird.f32 %v1010_v52 }
 0x1ac   : > { %v993_v56 = vmul.f32 %v1287_v55, %v991_v43  ;;  %vm998_vm12 = vweird.f32 %v1287_v55  ;;  %v1133_v43 = vld [vmem:[%s1645_s7 + $0x70] sm:$0xff] }
 0x1ad   : > { %vm999_vm14 = vmor %vm997_vm13, %vm998_vm12  ;;  %v1023_v12 = vor.u32 1.1754944e-38, %v1022_v6  ;;  %vm1021_vm3 = vcmp.eq.f32.partialorder %v1020_v9, 8.507059e+37  ;;  %1136 = vmatpush.msra.mxu1 %v1133_v43 }
 0x1ae   : > { %v994_v58 = vsub.f32 1.0, %v993_v56 }
 0x1af   : > { %1137 = vmatpush.msra.mxu1 %v1132_v44 }
 0x1b0   : > { %v1289_v60 = vpop.eup %1288  ;;  %v995_v61 = vmul.f32 %v1287_v55, %v994_v58 }
 0x1b1   : > { %v1291_v62 = vpop.eup %1290  ;;  %v1030_v0 = vadd.f32 1.0, %v1289_v60  ;;  %1138 = vmatpush.msra.mxu1 %v1131_v45  ;;  %v1120_v60 = vld [vmem:[%s1645_s7 + $0x8] sm:$0xff] }
 0x1b2   : > { %v1012_v1 = vmul.f32 %v1291_v62, %v1010_v52  ;;  %v996_v2 = vadd.f32 %v1287_v55, %v995_v61  ;;  %vm1017_vm15 = vweird.f32 %v1291_v62  ;;  %v1124_v52 = vld [vmem:[%s1645_s7 + $0x28] sm:$0xff]  ;;  %v1119_v61 = vld [vmem:[%s1645_s7] sm:$0xff] }
 0x1b3   : > { %1292 = vrcp.f32 %v1030_v0  ;;  %vm1018_vm2 = vmor %vm1016_vm0, %vm1017_vm15  ;;  %v1042_v25 = vand.u32 2147483648, %v1030_v0  ;;  %vm1036_vm5 = vweird.f32 %v1030_v0  ;;  %v1040_v26 = vand.u32 2147483647, %v1030_v0  ;;  %1139 = vmatpush.msra.mxu1 %v1130_v46 }
 0x1b4   : > { %v1013_v4 = vsub.f32 1.0, %v1012_v1  ;;  %1294 = vtanh.f32 %v946_v63  ;;  %v1000_v8 = vsel %vm999_vm14, %v1287_v55, %v996_v2 }
 0x1b5   : > { %v1005_v13 = vsel %vm1002_vm1, %v1004_v10, %v1000_v8  ;;  %v1043_v28 = vor.u32 1.1754944e-38, %v1042_v25  ;;  %vm1041_vm7 = vcmp.eq.f32.partialorder %v1040_v26, 8.507059e+37  ;;  %1140 = vmatpush.msra.mxu1 %v1129_v47 }
 0x1b6   : > { %v1014_v7 = vmul.f32 %v1291_v62, %v1013_v4 }
 0x1b7   : > { %1141 = vmatpush.msra.mxu1 %v1128_v48 }
 0x1b8   : > { %v1015_v42 = vadd.f32 %v1291_v62, %v1014_v7 }
 0x1b9   : > { %v1293_v11 = vpop.eup %1292  ;;  %1142 = vmatpush.msra.mxu1 %v1127_v49 }
 0x1ba   : > { %v1019_v15 = vsel %vm1018_vm2, %v1291_v62, %v1015_v42  ;;  %v1032_v16 = vmul.f32 %v1293_v11, %v1030_v0  ;;  %v1295_v17 = vpop.eup %1294  ;;  %vm1037_vm4 = vweird.f32 %v1293_v11 }
 0x1bb   : > { %v1024_v18 = vsel %vm1021_vm3, %v1023_v12, %v1019_v15  ;;  %v1049_v20 = vmul.f32 %v1295_v17, %v1005_v13  ;;  %vm1038_vm6 = vmor %vm1036_vm5, %vm1037_vm4  ;;  %1143 = vmatpush.msra.mxu1 %v1126_v50 }
 0x1bc   : > { %v1048_v19 = vmul.f32 %v1047_v14, %v1024_v18  ;;  %v1033_v21 = vsub.f32 1.0, %v1032_v16 }
 0x1bd   : > { %1144 = vmatpush.msra.mxu1 %v1125_v51 }
 0x1be   : > { %v1050_v22 = vadd.f32 %v1049_v20, %v1048_v19  ;;  %v1034_v23 = vmul.f32 %v1293_v11, %v1033_v21 }
 0x1bf   : > { %1145 = vmatpush.msra.mxu1 %v1124_v52 }
 0x1c0   : > { %1296 = vtanh.f32 %v1050_v22  ;;  %1053 = vst [vmem:[#allocation3] sm:$0xff] %v1050_v22  ;;  %v1035_v24 = vadd.f32 %v1293_v11, %v1034_v23 }
 0x1c1   : > { %1146 = vmatpush.msra.mxu1 %v1123_v53 }
 0x1c2   : > { %v1039_v27 = vsel %vm1038_vm6, %v1293_v11, %v1035_v24 }
 0x1c3   : > { %v1044_v30 = vsel %vm1041_vm7, %v1043_v28, %v1039_v27  ;;  %1147 = vmatpush.msra.mxu1 %v1122_v54 }
 0x1c5   : > { %1148 = vmatpush.msra.mxu1 %v1121_v59 }
 0x1c6   : > { %v1297_v29 = vpop.eup %1296 }
 0x1c7   : > { %v1052_v31 = vmul.f32 %v1297_v29, %v1044_v30  ;;  %1149 = vmatpush.msra.mxu1 %v1120_v60 }
 0x1c9   : > { %1054 = vst [vmem:[#allocation2 + $0x8] sm:$0xff] %v1052_v31  ;;  %1091 = vmatmul.f32.vlgmr.msra.gmra.mxu0 %v1052_v31  ;;  %1150 = vmatpush.msra.mxu1 %v1119_v61 }
 0x246   : > { %v1092_v33 = vpop.f32.mrf.mxu0 }
 0x247   : > { %v1093_v34 = vadd.f32 %v1265_v32, %v1092_v33 }
 0x249   : > { %1095 = vst [vmem:[%s1438_s26] sm:$0xff] %v1093_v34  ;;  %1098 = vmax.xlane.f32.xlu0 %v1093_v34 }
 0x2bc   : > { %v1099_v37 = vpop.xlane.xlu0 %1098 }
 0x2bd   : > { %vm1100_vm8 = vcmp.eq.f32.partialorder %v1093_v34, %v1099_v37 }
 0x2be   : > { %v1101_v38 = vsel %vm1100_vm8, %v1097_v36, 128 }
 0x2bf   : > { %v1103_v39 = vshra.s32 %v1101_v38, 16  ;;  %v1102_v55 = vand.u32 65535, %v1101_v38 }
 0x2c1   : > { %v1105_v40 = vcvt.s32.f32 %v1103_v39  ;;  %v1104_v57 = vcvt.s32.f32 %v1102_v55 }
 0x2c3   : > { %1106 = vmin.xlane.f32.xlu0 %v1105_v40 }
 0x336   : > { %v1107_v56 = vpop.xlane.xlu0 %1106 }
 0x337   : > { %vm1108_vm9 = vcmp.eq.f32.partialorder %v1105_v40, %v1107_v56  ;;  %v1113_v62 = vcvt.f32.s32 %v1107_v56 }
 0x338   : > { %v1109_v58 = vsel %vm1108_vm9, %v1104_v57, inf }
 0x339   : > { %1110 = vmin.xlane.f32.xlu1 %v1109_v58  ;;  %v1114_v0 = vshll.u32 %v1113_v62, 16 }
 0x3ac   : > { %v1111_v63 = vpop.xlane.xlu1 %1110 }
 0x3ad   : > { %v1112_v1 = vcvt.f32.s32 %v1111_v63 }
 0x3af   : > { %v1115_v2 = vadd.s32 %v1114_v0, %v1112_v1 }
 0x3b1   : > { %vm1116_vm10 = vcmp.eq.s32.totalorder %v1097_v36, %v1115_v2 }
 0x3b2   : > { %1239 = vmatmul.msk.f32.vlgmr.msra.gmra.mxu1 %vm1116_vm10, %v1358_v3 }
 0x42f   : > { %v1152_v4 = vpop.f32.mrf.mxu1 }
 0x430   : > { %1155 = vst [vmem:[#allocation4] sm:$0xff] %v1152_v4 }
 0x431 PF: > { %s27_s9 = sadd.s32 1, %s1352_s9  }
 0x432   : > { %p24_p11 = scmp.ge.s32.totalorder %s27_s9, 9  }
 0x434   :  { %26 = sbr.rel (!%p24_p11) target bundleno = 7 (0x7), region = 95 }
 0x439   :  { %1175 = vsyncpa [#allocation8], 1 }
 0x43a   :  { %1177 = vsyncpa [#allocation8 + $0x1], 1 }

// kernel: encoder_decoder_forward.2
= control target key start
LH: loop header
LB: loop body
LE: loop exit
PB: predicated region body
PF: predicated region fallthrough
CT: control target
= control target key end

     0   :  { %8 = vsyncpa [#allocation5], 0  ;;  %s1099_s12 = smov 0   ;;  %s1218_s0 = inlined_call_operand.vmem [shape: f32[8,8,128], index: 0, kind: input, shape index: {}]   ;;  %s1219_s1 = inlined_call_operand.hbm [shape: f32[2,256,512], index: 1, kind: input, shape index: {}]   ;;  %s1220_s2 = inlined_call_operand.vmem [shape: f32[2,1,512], index: 2, kind: input, shape index: {}]   ;;  %s1221_s3 = inlined_call_operand.vmem [shape: f32[2,8,128], index: 3, kind: output, shape index: {}]  }
   0x1 LB: > { %s119_s15 = sshll.u32 %s1219_s1, 4  ;;  %s1108_s16 = sadd.s32 4294967295, %s1073_s12   ;;  %s1073_s12 = sphi %s1099_s12, %s14_s12   ;;  %s120_s15 = int_to_ptr.hbm [resolvable:$true] %s119_s15 }
   0x2   : > { %p962_p0 = scmp.ge.s32.totalorder %s1073_s12, 1  ;;  %p108_p1 = scmp.lt.s32.totalorder %s1073_s12, 9 }
   0x3   : > { %p963_p2 = scmp.ne.s32.totalorder %s1108_s16, 0  ;;  %p987_p3 = scmp.eq.s32.totalorder %s1108_s16, 0 }
   0x4   : > { %p109_p4 = pnand %p962_p0, %p108_p1  ;;  %s1075_s17 = smov [#allocation4]  }
   0x5   : > { %s121_s18 = sshll.u32 %s1075_s17, 4  ;;  %s1076_s19 = smov 512   ;;  %s122_s18 = int_to_ptr.vmem [resolvable:$true] %s121_s18 }
   0x6   : > { %p983_p5 = pneg %p109_p4  ;;  %s1077_s20 = smov 32  }
   0x7   : > { %147 = sbr.rel (%p109_p4) target bundleno = 437 (0x1b5), region = 32 }
   0x8   : > { %p984_p6 = pnand %p987_p3, %p983_p5 }
   0xa   : > { %986 = dma.hbm_to_vmem [thread:$0]  (!%p984_p6), %s120_s15, 32768, %s122_s18, [#allocation5], %s1076_s19, %s1076_s19, %s1077_s20  }
   0xc   : > { %1068 = dma.done.wait (%p987_p3), [#allocation5], 32768  }
   0xd   : > { %1070 = vsyncadd (%p987_p3), [#allocation5], 4294934528  ;;  %p166_p7 = scmp.lt.s32.totalorder %s1108_s16, 7 }
   0xe   : > { %173 = sbr.rel (%p963_p2) target bundleno = 24 (0x18), region = 40 }
   0xf   : > { %s167_s21 = scalar_select %p166_p7, %s1108_s16, 7 }
  0x11   : > { %s967_s22 = sshll.u32 %s167_s21, 3 }
  0x12   : > { %s1119_s25 = scalar_lea.vmem %s1218_s0, %s967_s22 }
  0x13   : > { %v1078_v0 = vmov 0.0  }
  0x14   : > { %174 = vst [vmem:[#allocation2] sm:$0xff] %v1078_v0 }
  0x15   : > { %175 = vst [vmem:[#allocation2 + $0x8] sm:$0xff] %v1078_v0 }
  0x16   : > { %176 = vst [vmem:[#allocation3 + $0x8] sm:$0xff] %v1078_v0 }
  0x17   : > { %177 = vst [vmem:[#allocation3] sm:$0xff] %v1078_v0 }
  0x18 PF: > { %v241_v1 = vld [vmem:[#allocation4 + $0x1e8] sm:$0xff]  ;;  %v240_v4 = vld [vmem:[#allocation4 + $0x1e0] sm:$0xff]  ;;  %v243_v62 = vld [vmem:[#allocation4 + $0x1f8] sm:$0xff]  ;;  %p976_p8 = scmp.ne.s32.totalorder %s1108_s16, 7 }
  0x19   : > { %v237_v2 = vld [vmem:[#allocation4 + $0x1c8] sm:$0xff]  ;;  %358 = vmatpush.msra.mxu2 %v241_v1  ;;  %318 = vmatpush.msra.mxu0 %v240_v4  ;;  %v236_v7 = vld [vmem:[#allocation4 + $0x1c0] sm:$0xff]  ;;  %v307_v1 = vld [vmem:[#allocation4 + $0x3f8] sm:$0xff] }
  0x1a   : > { %v305_v3 = vld [vmem:[#allocation4 + $0x3e8] sm:$0xff]  ;;  %v304_v8 = vld [vmem:[#allocation4 + $0x3e0] sm:$0xff] }
  0x1b   : > { %378 = vmatpush.msra.mxu3 %v305_v3  ;;  %v301_v5 = vld [vmem:[#allocation4 + $0x3c8] sm:$0xff]  ;;  %359 = vmatpush.msra.mxu2 %v237_v2  ;;  %v232_v10 = vld [vmem:[#allocation4 + $0x1a0] sm:$0xff]  ;;  %v239_v2 = vld [vmem:[#allocation4 + $0x1d8] sm:$0xff] }
  0x1c   : > { %v233_v6 = vld [vmem:[#allocation4 + $0x1a8] sm:$0xff]  ;;  %v300_v11 = vld [vmem:[#allocation4 + $0x3c0] sm:$0xff]  ;;  %319 = vmatpush.msra.mxu0 %v236_v7  ;;  %338 = vmatpush.msra.mxu1 %v304_v8  ;;  %v242_v3 = vld [vmem:[#allocation4 + $0x1f0] sm:$0xff] }
  0x1d   : > { %379 = vmatpush.msra.mxu3 %v301_v5  ;;  %v297_v9 = vld [vmem:[#allocation4 + $0x3a8] sm:$0xff]  ;;  %360 = vmatpush.msra.mxu2 %v233_v6  ;;  %v228_v14 = vld [vmem:[#allocation4 + $0x180] sm:$0xff]  ;;  %v303_v5 = vld [vmem:[#allocation4 + $0x3d8] sm:$0xff] }
  0x1e   : > { %v229_v12 = vld [vmem:[#allocation4 + $0x188] sm:$0xff]  ;;  %v296_v15 = vld [vmem:[#allocation4 + $0x3a0] sm:$0xff]  ;;  %320 = vmatpush.msra.mxu0 %v232_v10  ;;  %339 = vmatpush.msra.mxu1 %v300_v11  ;;  %v235_v6 = vld [vmem:[#allocation4 + $0x1b8] sm:$0xff] }
  0x1f   : > { %v293_v13 = vld [vmem:[#allocation4 + $0x388] sm:$0xff]  ;;  %380 = vmatpush.msra.mxu3 %v297_v9  ;;  %361 = vmatpush.msra.mxu2 %v229_v12  ;;  %v224_v18 = vld [vmem:[#allocation4 + $0x160] sm:$0xff]  ;;  %v238_v7 = vld [vmem:[#allocation4 + $0x1d0] sm:$0xff] }
  0x20   : > { %v225_v16 = vld [vmem:[#allocation4 + $0x168] sm:$0xff]  ;;  %v292_v19 = vld [vmem:[#allocation4 + $0x380] sm:$0xff]  ;;  %321 = vmatpush.msra.mxu0 %v228_v14  ;;  %340 = vmatpush.msra.mxu1 %v296_v15  ;;  %v306_v8 = vld [vmem:[#allocation4 + $0x3f0] sm:$0xff] }
  0x21   : > { %v289_v17 = vld [vmem:[#allocation4 + $0x368] sm:$0xff]  ;;  %381 = vmatpush.msra.mxu3 %v293_v13  ;;  %362 = vmatpush.msra.mxu2 %v225_v16  ;;  %v220_v22 = vld [vmem:[#allocation4 + $0x140] sm:$0xff]  ;;  %v299_v9 = vld [vmem:[#allocation4 + $0x3b8] sm:$0xff] }
  0x22   : > { %v221_v20 = vld [vmem:[#allocation4 + $0x148] sm:$0xff]  ;;  %v288_v23 = vld [vmem:[#allocation4 + $0x360] sm:$0xff]  ;;  %322 = vmatpush.msra.mxu0 %v224_v18  ;;  %341 = vmatpush.msra.mxu1 %v292_v19  ;;  %v231_v10 = vld [vmem:[#allocation4 + $0x198] sm:$0xff] }
  0x23   : > { %v285_v21 = vld [vmem:[#allocation4 + $0x348] sm:$0xff]  ;;  %382 = vmatpush.msra.mxu3 %v289_v17  ;;  %363 = vmatpush.msra.mxu2 %v221_v20  ;;  %v216_v26 = vld [vmem:[#allocation4 + $0x120] sm:$0xff]  ;;  %v234_v11 = vld [vmem:[#allocation4 + $0x1b0] sm:$0xff] }
  0x24   : > { %v217_v24 = vld [vmem:[#allocation4 + $0x128] sm:$0xff]  ;;  %v284_v27 = vld [vmem:[#allocation4 + $0x340] sm:$0xff]  ;;  %323 = vmatpush.msra.mxu0 %v220_v22  ;;  %342 = vmatpush.msra.mxu1 %v288_v23  ;;  %v302_v13 = vld [vmem:[#allocation4 + $0x3d0] sm:$0xff] }
  0x25   : > { %v281_v25 = vld [vmem:[#allocation4 + $0x328] sm:$0xff]  ;;  %383 = vmatpush.msra.mxu3 %v285_v21  ;;  %364 = vmatpush.msra.mxu2 %v217_v24  ;;  %v212_v30 = vld [vmem:[#allocation4 + $0x100] sm:$0xff]  ;;  %v227_v14 = vld [vmem:[#allocation4 + $0x178] sm:$0xff] }
  0x26   : > { %v213_v28 = vld [vmem:[#allocation4 + $0x108] sm:$0xff]  ;;  %v280_v31 = vld [vmem:[#allocation4 + $0x320] sm:$0xff]  ;;  %324 = vmatpush.msra.mxu0 %v216_v26  ;;  %343 = vmatpush.msra.mxu1 %v284_v27  ;;  %v295_v15 = vld [vmem:[#allocation4 + $0x398] sm:$0xff] }
  0x27   : > { %v277_v29 = vld [vmem:[#allocation4 + $0x308] sm:$0xff]  ;;  %384 = vmatpush.msra.mxu3 %v281_v25  ;;  %365 = vmatpush.msra.mxu2 %v213_v28  ;;  %v208_v34 = vld [vmem:[#allocation4 + $0xe0] sm:$0xff]  ;;  %v230_v17 = vld [vmem:[#allocation4 + $0x190] sm:$0xff] }
  0x28   : > { %v209_v32 = vld [vmem:[#allocation4 + $0xe8] sm:$0xff]  ;;  %v276_v35 = vld [vmem:[#allocation4 + $0x300] sm:$0xff]  ;;  %325 = vmatpush.msra.mxu0 %v212_v30  ;;  %344 = vmatpush.msra.mxu1 %v280_v31  ;;  %v298_v18 = vld [vmem:[#allocation4 + $0x3b0] sm:$0xff] }
  0x29   : > { %v273_v33 = vld [vmem:[#allocation4 + $0x2e8] sm:$0xff]  ;;  %385 = vmatpush.msra.mxu3 %v277_v29  ;;  %366 = vmatpush.msra.mxu2 %v209_v32  ;;  %v204_v38 = vld [vmem:[#allocation4 + $0xc0] sm:$0xff]  ;;  %v223_v19 = vld [vmem:[#allocation4 + $0x158] sm:$0xff] }
  0x2a   : > { %v205_v36 = vld [vmem:[#allocation4 + $0xc8] sm:$0xff]  ;;  %v272_v39 = vld [vmem:[#allocation4 + $0x2e0] sm:$0xff]  ;;  %326 = vmatpush.msra.mxu0 %v208_v34  ;;  %345 = vmatpush.msra.mxu1 %v276_v35  ;;  %v291_v20 = vld [vmem:[#allocation4 + $0x378] sm:$0xff] }
  0x2b   : > { %v269_v37 = vld [vmem:[#allocation4 + $0x2c8] sm:$0xff]  ;;  %386 = vmatpush.msra.mxu3 %v273_v33  ;;  %367 = vmatpush.msra.mxu2 %v205_v36  ;;  %v200_v42 = vld [vmem:[#allocation4 + $0xa0] sm:$0xff]  ;;  %v226_v21 = vld [vmem:[#allocation4 + $0x170] sm:$0xff] }
  0x2c   : > { %v201_v40 = vld [vmem:[#allocation4 + $0xa8] sm:$0xff]  ;;  %v268_v43 = vld [vmem:[#allocation4 + $0x2c0] sm:$0xff]  ;;  %327 = vmatpush.msra.mxu0 %v204_v38  ;;  %346 = vmatpush.msra.mxu1 %v272_v39  ;;  %v294_v22 = vld [vmem:[#allocation4 + $0x390] sm:$0xff] }
  0x2d   : > { %v265_v41 = vld [vmem:[#allocation4 + $0x2a8] sm:$0xff]  ;;  %387 = vmatpush.msra.mxu3 %v269_v37  ;;  %368 = vmatpush.msra.mxu2 %v201_v40  ;;  %v196_v46 = vld [vmem:[#allocation4 + $0x80] sm:$0xff]  ;;  %v219_v23 = vld [vmem:[#allocation4 + $0x138] sm:$0xff] }
  0x2e   : > { %v197_v44 = vld [vmem:[#allocation4 + $0x88] sm:$0xff]  ;;  %v264_v47 = vld [vmem:[#allocation4 + $0x2a0] sm:$0xff]  ;;  %328 = vmatpush.msra.mxu0 %v200_v42  ;;  %347 = vmatpush.msra.mxu1 %v268_v43  ;;  %v287_v24 = vld [vmem:[#allocation4 + $0x358] sm:$0xff] }
  0x2f   : > { %v261_v45 = vld [vmem:[#allocation4 + $0x288] sm:$0xff]  ;;  %388 = vmatpush.msra.mxu3 %v265_v41  ;;  %369 = vmatpush.msra.mxu2 %v197_v44  ;;  %v192_v50 = vld [vmem:[#allocation4 + $0x60] sm:$0xff]  ;;  %v222_v25 = vld [vmem:[#allocation4 + $0x150] sm:$0xff] }
  0x30   : > { %v193_v48 = vld [vmem:[#allocation4 + $0x68] sm:$0xff]  ;;  %v260_v51 = vld [vmem:[#allocation4 + $0x280] sm:$0xff]  ;;  %329 = vmatpush.msra.mxu0 %v196_v46  ;;  %348 = vmatpush.msra.mxu1 %v264_v47  ;;  %v290_v26 = vld [vmem:[#allocation4 + $0x370] sm:$0xff] }
  0x31   : > { %v257_v49 = vld [vmem:[#allocation4 + $0x268] sm:$0xff]  ;;  %389 = vmatpush.msra.mxu3 %v261_v45  ;;  %370 = vmatpush.msra.mxu2 %v193_v48  ;;  %v188_v54 = vld [vmem:[#allocation4 + $0x40] sm:$0xff]  ;;  %v215_v27 = vld [vmem:[#allocation4 + $0x118] sm:$0xff] }
  0x32   : > { %v189_v52 = vld [vmem:[#allocation4 + $0x48] sm:$0xff]  ;;  %v256_v55 = vld [vmem:[#allocation4 + $0x260] sm:$0xff]  ;;  %330 = vmatpush.msra.mxu0 %v192_v50  ;;  %349 = vmatpush.msra.mxu1 %v260_v51  ;;  %v283_v28 = vld [vmem:[#allocation4 + $0x338] sm:$0xff] }
  0x33   : > { %v253_v53 = vld [vmem:[#allocation4 + $0x248] sm:$0xff]  ;;  %390 = vmatpush.msra.mxu3 %v257_v49  ;;  %371 = vmatpush.msra.mxu2 %v189_v52  ;;  %v184_v58 = vld [vmem:[#allocation4 + $0x20] sm:$0xff]  ;;  %v218_v29 = vld [vmem:[#allocation4 + $0x130] sm:$0xff] }
  0x34   : > { %v185_v56 = vld [vmem:[#allocation4 + $0x28] sm:$0xff]  ;;  %v252_v59 = vld [vmem:[#allocation4 + $0x240] sm:$0xff]  ;;  %331 = vmatpush.msra.mxu0 %v188_v54  ;;  %350 = vmatpush.msra.mxu1 %v256_v55  ;;  %v286_v30 = vld [vmem:[#allocation4 + $0x350] sm:$0xff] }
  0x35   : > { %v249_v57 = vld [vmem:[#allocation4 + $0x228] sm:$0xff]  ;;  %391 = vmatpush.msra.mxu3 %v253_v53  ;;  %372 = vmatpush.msra.mxu2 %v185_v56  ;;  %v180_v63 = vld [vmem:[#allocation4] sm:$0xff]  ;;  %v211_v31 = vld [vmem:[#allocation4 + $0xf8] sm:$0xff] }
  0x36   : > { %v181_v60 = vld [vmem:[#allocation4 + $0x8] sm:$0xff]  ;;  %332 = vmatpush.msra.mxu0 %v184_v58  ;;  %351 = vmatpush.msra.mxu1 %v252_v59  ;;  %v248_v0 = vld [vmem:[#allocation4 + $0x220] sm:$0xff]  ;;  %v279_v32 = vld [vmem:[#allocation4 + $0x318] sm:$0xff] }
  0x37   : > { %v245_v61 = vld [vmem:[#allocation4 + $0x208] sm:$0xff]  ;;  %392 = vmatpush.msra.mxu3 %v249_v57  ;;  %373 = vmatpush.msra.mxu2 %v181_v60  ;;  %v244_v4 = vld [vmem:[#allocation4 + $0x200] sm:$0xff]  ;;  %v214_v33 = vld [vmem:[#allocation4 + $0x110] sm:$0xff] }
  0x38   : > { %333 = vmatpush.msra.mxu0 %v180_v63  ;;  %352 = vmatpush.msra.mxu1 %v248_v0  ;;  %v1124_v12 = vld [vmem:[%s1119_s25] sm:$0xff]  ;;  %v282_v34 = vld [vmem:[#allocation4 + $0x330] sm:$0xff]  ;;  %v207_v35 = vld [vmem:[#allocation4 + $0xd8] sm:$0xff] }
  0x39   : > { %393 = vmatpush.msra.mxu3 %v245_v61  ;;  %438 = vmatpush.msrb.mxu2 %v243_v62  ;;  %v1126_v16 = vld [vmem:[#allocation2] sm:$0xff]  ;;  %v275_v36 = vld [vmem:[#allocation4 + $0x2f8] sm:$0xff]  ;;  %v210_v37 = vld [vmem:[#allocation4 + $0xf0] sm:$0xff] }
  0x3a   : > { %398 = vmatpush.msrb.mxu0 %v242_v3  ;;  %353 = vmatpush.msra.mxu1 %v244_v4  ;;  %v278_v38 = vld [vmem:[#allocation4 + $0x310] sm:$0xff]  ;;  %v203_v39 = vld [vmem:[#allocation4 + $0xb8] sm:$0xff]  ;;  %v607_v3 = vld [vmem:[#allocation4 + $0x5e0] sm:$0xff] }
  0x3b   : > { %458 = vmatpush.msrb.mxu3 %v307_v1  ;;  %439 = vmatpush.msrb.mxu2 %v239_v2  ;;  %v271_v40 = vld [vmem:[#allocation4 + $0x2d8] sm:$0xff]  ;;  %v206_v41 = vld [vmem:[#allocation4 + $0xd0] sm:$0xff]  ;;  %v608_v4 = vld [vmem:[#allocation4 + $0x5e8] sm:$0xff] }
  0x3c   : > { %399 = vmatpush.msrb.mxu0 %v238_v7  ;;  %418 = vmatpush.msrb.mxu1 %v306_v8  ;;  %v274_v42 = vld [vmem:[#allocation4 + $0x2f0] sm:$0xff]  ;;  %v199_v43 = vld [vmem:[#allocation4 + $0x98] sm:$0xff]  ;;  %v604_v7 = vld [vmem:[#allocation4 + $0x5c8] sm:$0xff] }
  0x3d   : > { %459 = vmatpush.msrb.mxu3 %v303_v5  ;;  %440 = vmatpush.msrb.mxu2 %v235_v6  ;;  %v267_v44 = vld [vmem:[#allocation4 + $0x2b8] sm:$0xff]  ;;  %v202_v45 = vld [vmem:[#allocation4 + $0xb0] sm:$0xff]  ;;  %v603_v5 = vld [vmem:[#allocation4 + $0x5c0] sm:$0xff] }
  0x3e   : > { %400 = vmatpush.msrb.mxu0 %v234_v11  ;;  %374 = vmatmul.f32.vlgmr.msra.gmra.mxu2 %v1124_v12  ;;  %v270_v46 = vld [vmem:[#allocation4 + $0x2d0] sm:$0xff]  ;;  %v195_v47 = vld [vmem:[#allocation4 + $0x78] sm:$0xff]  ;;  %v671_v6 = vld [vmem:[#allocation4 + $0x7e0] sm:$0xff] }
  0x3f   : > { %460 = vmatpush.msrb.mxu3 %v299_v9  ;;  %441 = vmatpush.msrb.mxu2 %v231_v10  ;;  %v263_v48 = vld [vmem:[#allocation4 + $0x298] sm:$0xff]  ;;  %v198_v49 = vld [vmem:[#allocation4 + $0x90] sm:$0xff]  ;;  %v672_v8 = vld [vmem:[#allocation4 + $0x7e8] sm:$0xff] }
  0x40   : > { %419 = vmatpush.msrb.mxu1 %v302_v13  ;;  %394 = vmatmul.f32.vlgmr.msra.gmra.mxu3 %v1126_v16  ;;  %v266_v50 = vld [vmem:[#allocation4 + $0x2b0] sm:$0xff]  ;;  %v191_v51 = vld [vmem:[#allocation4 + $0x58] sm:$0xff]  ;;  %v599_v9 = vld [vmem:[#allocation4 + $0x5a0] sm:$0xff] }
  0x41   : > { %442 = vmatpush.msrb.mxu2 %v227_v14  ;;  %461 = vmatpush.msrb.mxu3 %v295_v15  ;;  %v259_v52 = vld [vmem:[#allocation4 + $0x278] sm:$0xff]  ;;  %v194_v53 = vld [vmem:[#allocation4 + $0x70] sm:$0xff]  ;;  %v667_v10 = vld [vmem:[#allocation4 + $0x7c0] sm:$0xff] }
  0x42   : > { %401 = vmatpush.msrb.mxu0 %v230_v17  ;;  %420 = vmatpush.msrb.mxu1 %v298_v18  ;;  %v262_v54 = vld [vmem:[#allocation4 + $0x290] sm:$0xff]  ;;  %v187_v55 = vld [vmem:[#allocation4 + $0x38] sm:$0xff]  ;;  %v600_v11 = vld [vmem:[#allocation4 + $0x5a8] sm:$0xff] }
  0x43   : > { %443 = vmatpush.msrb.mxu2 %v223_v19  ;;  %462 = vmatpush.msrb.mxu3 %v291_v20  ;;  %v255_v56 = vld [vmem:[#allocation4 + $0x258] sm:$0xff]  ;;  %v190_v57 = vld [vmem:[#allocation4 + $0x50] sm:$0xff]  ;;  %v595_v13 = vld [vmem:[#allocation4 + $0x580] sm:$0xff] }
  0x44   : > { %402 = vmatpush.msrb.mxu0 %v226_v21  ;;  %421 = vmatpush.msrb.mxu1 %v294_v22  ;;  %v258_v58 = vld [vmem:[#allocation4 + $0x270] sm:$0xff]  ;;  %v183_v59 = vld [vmem:[#allocation4 + $0x18] sm:$0xff]  ;;  %v663_v14 = vld [vmem:[#allocation4 + $0x7a0] sm:$0xff] }
  0x45   : > { %444 = vmatpush.msrb.mxu2 %v219_v23  ;;  %463 = vmatpush.msrb.mxu3 %v287_v24  ;;  %v251_v60 = vld [vmem:[#allocation4 + $0x238] sm:$0xff]  ;;  %v186_v61 = vld [vmem:[#allocation4 + $0x30] sm:$0xff]  ;;  %v596_v15 = vld [vmem:[#allocation4 + $0x588] sm:$0xff] }
  0x46   : > { %334 = vmatmul.f32.vlgmr.msra.gmra.mxu0 %v1124_v12  ;;  %422 = vmatpush.msrb.mxu1 %v290_v26  ;;  %v254_v62 = vld [vmem:[#allocation4 + $0x250] sm:$0xff]  ;;  %v247_v63 = vld [vmem:[#allocation4 + $0x218] sm:$0xff]  ;;  %v591_v17 = vld [vmem:[#allocation4 + $0x560] sm:$0xff] }
  0x47   : > { %403 = vmatpush.msrb.mxu0 %v222_v25  ;;  %445 = vmatpush.msrb.mxu2 %v215_v27  ;;  %v182_v0 = vld [vmem:[#allocation4 + $0x10] sm:$0xff]  ;;  %v659_v18 = vld [vmem:[#allocation4 + $0x780] sm:$0xff]  ;;  %v592_v19 = vld [vmem:[#allocation4 + $0x568] sm:$0xff] }
  0x48   : > { %464 = vmatpush.msrb.mxu3 %v283_v28  ;;  %354 = vmatmul.f32.vlgmr.msra.gmra.mxu1 %v1126_v16  ;;  %v250_v1 = vld [vmem:[#allocation4 + $0x230] sm:$0xff]  ;;  %v660_v20 = vld [vmem:[#allocation4 + $0x788] sm:$0xff]  ;;  %v587_v21 = vld [vmem:[#allocation4 + $0x540] sm:$0xff] }
  0x49   : > { %404 = vmatpush.msrb.mxu0 %v218_v29  ;;  %423 = vmatpush.msrb.mxu1 %v286_v30  ;;  %v246_v2 = vld [vmem:[#allocation4 + $0x210] sm:$0xff]  ;;  %v655_v22 = vld [vmem:[#allocation4 + $0x760] sm:$0xff]  ;;  %v588_v23 = vld [vmem:[#allocation4 + $0x548] sm:$0xff] }
  0x4a   : > { %446 = vmatpush.msrb.mxu2 %v211_v31  ;;  %465 = vmatpush.msrb.mxu3 %v279_v32  ;;  %v656_v24 = vld [vmem:[#allocation4 + $0x768] sm:$0xff]  ;;  %v583_v25 = vld [vmem:[#allocation4 + $0x520] sm:$0xff] }
  0x4b   : > { %405 = vmatpush.msrb.mxu0 %v214_v33  ;;  %424 = vmatpush.msrb.mxu1 %v282_v34  ;;  %v651_v26 = vld [vmem:[#allocation4 + $0x740] sm:$0xff]  ;;  %v584_v27 = vld [vmem:[#allocation4 + $0x528] sm:$0xff] }
  0x4c   : > { %447 = vmatpush.msrb.mxu2 %v207_v35  ;;  %466 = vmatpush.msrb.mxu3 %v275_v36  ;;  %v652_v28 = vld [vmem:[#allocation4 + $0x748] sm:$0xff]  ;;  %v579_v29 = vld [vmem:[#allocation4 + $0x500] sm:$0xff] }
  0x4d   : > { %406 = vmatpush.msrb.mxu0 %v210_v37  ;;  %425 = vmatpush.msrb.mxu1 %v278_v38  ;;  %v647_v30 = vld [vmem:[#allocation4 + $0x720] sm:$0xff]  ;;  %v580_v31 = vld [vmem:[#allocation4 + $0x508] sm:$0xff] }
  0x4e   : > { %448 = vmatpush.msrb.mxu2 %v203_v39  ;;  %467 = vmatpush.msrb.mxu3 %v271_v40  ;;  %v648_v32 = vld [vmem:[#allocation4 + $0x728] sm:$0xff]  ;;  %v575_v33 = vld [vmem:[#allocation4 + $0x4e0] sm:$0xff] }
  0x4f   : > { %407 = vmatpush.msrb.mxu0 %v206_v41  ;;  %426 = vmatpush.msrb.mxu1 %v274_v42  ;;  %v643_v34 = vld [vmem:[#allocation4 + $0x700] sm:$0xff]  ;;  %v576_v35 = vld [vmem:[#allocation4 + $0x4e8] sm:$0xff] }
  0x50   : > { %449 = vmatpush.msrb.mxu2 %v199_v43  ;;  %468 = vmatpush.msrb.mxu3 %v267_v44  ;;  %v644_v36 = vld [vmem:[#allocation4 + $0x708] sm:$0xff]  ;;  %v571_v37 = vld [vmem:[#allocation4 + $0x4c0] sm:$0xff] }
  0x51   : > { %408 = vmatpush.msrb.mxu0 %v202_v45  ;;  %427 = vmatpush.msrb.mxu1 %v270_v46  ;;  %v639_v38 = vld [vmem:[#allocation4 + $0x6e0] sm:$0xff]  ;;  %v572_v39 = vld [vmem:[#allocation4 + $0x4c8] sm:$0xff] }
  0x52   : > { %450 = vmatpush.msrb.mxu2 %v195_v47  ;;  %469 = vmatpush.msrb.mxu3 %v263_v48  ;;  %v1139_v40 = vld [vmem:[%s1220_s2] sm:$0xf]  ;;  %v640_v41 = vld [vmem:[#allocation4 + $0x6e8] sm:$0xff] }
  0x53   : > { %409 = vmatpush.msrb.mxu0 %v198_v49  ;;  %428 = vmatpush.msrb.mxu1 %v266_v50  ;;  %v567_v42 = vld [vmem:[#allocation4 + $0x4a0] sm:$0xff]  ;;  %v568_v44 = vld [vmem:[#allocation4 + $0x4a8] sm:$0xff]  ;;  %v310_v49 = vperm.slane %v1139_v40, 0  ;;  %v311_v50 = vperm.slane %v1139_v40, 1 }
  0x54   : > { %451 = vmatpush.msrb.mxu2 %v191_v51  ;;  %470 = vmatpush.msrb.mxu3 %v259_v52  ;;  %v635_v43 = vld [vmem:[#allocation4 + $0x6c0] sm:$0xff]  ;;  %v636_v45 = vld [vmem:[#allocation4 + $0x6c8] sm:$0xff] }
  0x55   : > { %410 = vmatpush.msrb.mxu0 %v194_v53  ;;  %429 = vmatpush.msrb.mxu1 %v262_v54  ;;  %v563_v46 = vld [vmem:[#allocation4 + $0x480] sm:$0xff]  ;;  %v564_v48 = vld [vmem:[#allocation4 + $0x488] sm:$0xff] }
  0x56   : > { %452 = vmatpush.msrb.mxu2 %v187_v55  ;;  %471 = vmatpush.msrb.mxu3 %v255_v56  ;;  %v631_v47 = vld [vmem:[#allocation4 + $0x6a0] sm:$0xff]  ;;  %v632_v51 = vld [vmem:[#allocation4 + $0x6a8] sm:$0xff] }
  0x57   : > { %411 = vmatpush.msrb.mxu0 %v190_v57  ;;  %430 = vmatpush.msrb.mxu1 %v258_v58  ;;  %v559_v52 = vld [vmem:[#allocation4 + $0x460] sm:$0xff]  ;;  %v560_v54 = vld [vmem:[#allocation4 + $0x468] sm:$0xff] }
  0x58   : > { %453 = vmatpush.msrb.mxu2 %v183_v59  ;;  %472 = vmatpush.msrb.mxu3 %v251_v60  ;;  %v627_v53 = vld [vmem:[#allocation4 + $0x680] sm:$0xff]  ;;  %v628_v55 = vld [vmem:[#allocation4 + $0x688] sm:$0xff] }
  0x59   : > { %412 = vmatpush.msrb.mxu0 %v186_v61  ;;  %431 = vmatpush.msrb.mxu1 %v254_v62  ;;  %v555_v58 = vld [vmem:[#allocation4 + $0x440] sm:$0xff]  ;;  %v556_v60 = vld [vmem:[#allocation4 + $0x448] sm:$0xff] }
  0x5a   : > { %454 = vmatmul.f32.vlgmr.msrb.gmra.mxu2 %v1124_v12  ;;  %473 = vmatpush.msrb.mxu3 %v247_v63  ;;  %v623_v59 = vld [vmem:[#allocation4 + $0x660] sm:$0xff]  ;;  %v624_v63 = vld [vmem:[#allocation4 + $0x668] sm:$0xff] }
  0x5b   : > { %413 = vmatpush.msrb.mxu0 %v182_v0  ;;  %432 = vmatpush.msrb.mxu1 %v250_v1  ;;  %v551_v1 = vld [vmem:[#allocation4 + $0x420] sm:$0xff] }
  0x5c   : > { %474 = vmatmul.f32.vlgmr.msrb.gmra.mxu3 %v1126_v16  ;;  %414 = vmatmul.f32.vlgmr.msrb.gmra.mxu0 %v1124_v12  ;;  %v668_v12 = vld [vmem:[#allocation4 + $0x7c8] sm:$0xff] }
  0x5d   : > { %433 = vmatpush.msrb.mxu1 %v246_v2  ;;  %686 = vmatpush.msra.mxu0 %v607_v3  ;;  %v619_v2 = vld [vmem:[#allocation4 + $0x640] sm:$0xff]  ;;  %v552_v3 = vld [vmem:[#allocation4 + $0x428] sm:$0xff] }
  0x5e   : > { %434 = vmatmul.f32.vlgmr.msrb.gmra.mxu1 %v1126_v16  ;;  %726 = vmatpush.msra.mxu2 %v608_v4  ;;  %v664_v16 = vld [vmem:[#allocation4 + $0x7a8] sm:$0xff] }
  0x5f   : > { %687 = vmatpush.msra.mxu0 %v603_v5  ;;  %706 = vmatpush.msra.mxu1 %v671_v6  ;;  %v620_v6 = vld [vmem:[#allocation4 + $0x648] sm:$0xff] }
  0x60   : > { %727 = vmatpush.msra.mxu2 %v604_v7  ;;  %746 = vmatpush.msra.mxu3 %v672_v8  ;;  %v547_v8 = vld [vmem:[#allocation4 + $0x400] sm:$0xff] }
  0x61   : > { %688 = vmatpush.msra.mxu0 %v599_v9  ;;  %707 = vmatpush.msra.mxu1 %v667_v10  ;;  %v615_v9 = vld [vmem:[#allocation4 + $0x620] sm:$0xff]  ;;  %v548_v10 = vld [vmem:[#allocation4 + $0x408] sm:$0xff] }
  0x62   : > { %728 = vmatpush.msra.mxu2 %v600_v11  ;;  %747 = vmatpush.msra.mxu3 %v668_v12  ;;  %v616_v12 = vld [vmem:[#allocation4 + $0x628] sm:$0xff] }
  0x63   : > { %689 = vmatpush.msra.mxu0 %v595_v13  ;;  %708 = vmatpush.msra.mxu1 %v663_v14  ;;  %v609_v13 = vld [vmem:[#allocation4 + $0x5f0] sm:$0xff]  ;;  %v610_v14 = vld [vmem:[#allocation4 + $0x5f8] sm:$0xff] }
  0x64   : > { %729 = vmatpush.msra.mxu2 %v596_v15  ;;  %748 = vmatpush.msra.mxu3 %v664_v16  ;;  %v611_v16 = vld [vmem:[#allocation4 + $0x600] sm:$0xff] }
  0x65   : > { %690 = vmatpush.msra.mxu0 %v591_v17  ;;  %709 = vmatpush.msra.mxu1 %v659_v18  ;;  %v612_v17 = vld [vmem:[#allocation4 + $0x608] sm:$0xff]  ;;  %v605_v18 = vld [vmem:[#allocation4 + $0x5d0] sm:$0xff] }
  0x66   : > { %730 = vmatpush.msra.mxu2 %v592_v19  ;;  %749 = vmatpush.msra.mxu3 %v660_v20  ;;  %v673_v19 = vld [vmem:[#allocation4 + $0x7f0] sm:$0xff]  ;;  %v606_v20 = vld [vmem:[#allocation4 + $0x5d8] sm:$0xff] }
  0x67   : > { %691 = vmatpush.msra.mxu0 %v587_v21  ;;  %710 = vmatpush.msra.mxu1 %v655_v22  ;;  %v674_v21 = vld [vmem:[#allocation4 + $0x7f8] sm:$0xff]  ;;  %v601_v22 = vld [vmem:[#allocation4 + $0x5b0] sm:$0xff] }
  0x68   : > { %731 = vmatpush.msra.mxu2 %v588_v23  ;;  %750 = vmatpush.msra.mxu3 %v656_v24  ;;  %v669_v23 = vld [vmem:[#allocation4 + $0x7d0] sm:$0xff]  ;;  %v602_v24 = vld [vmem:[#allocation4 + $0x5b8] sm:$0xff] }
  0x69   : > { %692 = vmatpush.msra.mxu0 %v583_v25  ;;  %711 = vmatpush.msra.mxu1 %v651_v26  ;;  %v670_v25 = vld [vmem:[#allocation4 + $0x7d8] sm:$0xff]  ;;  %v597_v26 = vld [vmem:[#allocation4 + $0x590] sm:$0xff] }
  0x6a   : > { %732 = vmatpush.msra.mxu2 %v584_v27  ;;  %751 = vmatpush.msra.mxu3 %v652_v28  ;;  %v665_v27 = vld [vmem:[#allocation4 + $0x7b0] sm:$0xff]  ;;  %v598_v28 = vld [vmem:[#allocation4 + $0x598] sm:$0xff] }
  0x6b   : > { %693 = vmatpush.msra.mxu0 %v579_v29  ;;  %712 = vmatpush.msra.mxu1 %v647_v30  ;;  %v666_v29 = vld [vmem:[#allocation4 + $0x7b8] sm:$0xff] }
  0x6c   : > { %733 = vmatpush.msra.mxu2 %v580_v31  ;;  %752 = vmatpush.msra.mxu3 %v648_v32  ;;  %v593_v31 = vld [vmem:[#allocation4 + $0x570] sm:$0xff] }
  0x6d   : > { %694 = vmatpush.msra.mxu0 %v575_v33  ;;  %713 = vmatpush.msra.mxu1 %v643_v34  ;;  %v661_v32 = vld [vmem:[#allocation4 + $0x790] sm:$0xff]  ;;  %v594_v33 = vld [vmem:[#allocation4 + $0x578] sm:$0xff] }
  0x6e   : > { %734 = vmatpush.msra.mxu2 %v576_v35  ;;  %753 = vmatpush.msra.mxu3 %v644_v36  ;;  %v662_v36 = vld [vmem:[#allocation4 + $0x798] sm:$0xff] }
  0x6f   : > { %695 = vmatpush.msra.mxu0 %v571_v37  ;;  %714 = vmatpush.msra.mxu1 %v639_v38  ;;  %v589_v38 = vld [vmem:[#allocation4 + $0x550] sm:$0xff] }
  0x70   : > { %735 = vmatpush.msra.mxu2 %v572_v39  ;;  %754 = vmatpush.msra.mxu3 %v640_v41  ;;  %v657_v39 = vld [vmem:[#allocation4 + $0x770] sm:$0xff]  ;;  %v590_v41 = vld [vmem:[#allocation4 + $0x558] sm:$0xff] }
  0x71   : > { %696 = vmatpush.msra.mxu0 %v567_v42  ;;  %715 = vmatpush.msra.mxu1 %v635_v43  ;;  %v658_v42 = vld [vmem:[#allocation4 + $0x778] sm:$0xff]  ;;  %v585_v43 = vld [vmem:[#allocation4 + $0x530] sm:$0xff] }
  0x72   : > { %736 = vmatpush.msra.mxu2 %v568_v44  ;;  %755 = vmatpush.msra.mxu3 %v636_v45  ;;  %v653_v44 = vld [vmem:[#allocation4 + $0x750] sm:$0xff]  ;;  %v586_v45 = vld [vmem:[#allocation4 + $0x538] sm:$0xff] }
  0x73   : > { %697 = vmatpush.msra.mxu0 %v563_v46  ;;  %716 = vmatpush.msra.mxu1 %v631_v47  ;;  %v654_v46 = vld [vmem:[#allocation4 + $0x758] sm:$0xff]  ;;  %v581_v47 = vld [vmem:[#allocation4 + $0x510] sm:$0xff] }
  0x74   : > { %737 = vmatpush.msra.mxu2 %v564_v48  ;;  %756 = vmatpush.msra.mxu3 %v632_v51  ;;  %v649_v48 = vld [vmem:[#allocation4 + $0x730] sm:$0xff]  ;;  %v650_v51 = vld [vmem:[#allocation4 + $0x738] sm:$0xff] }
  0x75   : > { %698 = vmatpush.msra.mxu0 %v559_v52  ;;  %717 = vmatpush.msra.mxu1 %v627_v53  ;;  %v577_v52 = vld [vmem:[#allocation4 + $0x4f0] sm:$0xff] }
  0x76   : > { %738 = vmatpush.msra.mxu2 %v560_v54  ;;  %757 = vmatpush.msra.mxu3 %v628_v55  ;;  %v645_v53 = vld [vmem:[#allocation4 + $0x710] sm:$0xff]  ;;  %v578_v54 = vld [vmem:[#allocation4 + $0x4f8] sm:$0xff] }
  0x77   : > { %699 = vmatpush.msra.mxu0 %v555_v58  ;;  %718 = vmatpush.msra.mxu1 %v623_v59  ;;  %v641_v58 = vld [vmem:[#allocation4 + $0x6f0] sm:$0xff] }
  0x78   : > { %739 = vmatpush.msra.mxu2 %v556_v60  ;;  %758 = vmatpush.msra.mxu3 %v624_v63  ;;  %v313_v63 = vperm.slane %v1139_v40, 3 }
  0x79   : > { %700 = vmatpush.msra.mxu0 %v551_v1  ;;  %719 = vmatpush.msra.mxu1 %v619_v2  ;;  %v642_v1 = vld [vmem:[#allocation4 + $0x6f8] sm:$0xff] }
  0x7a   : > { %740 = vmatpush.msra.mxu2 %v552_v3  ;;  %759 = vmatpush.msra.mxu3 %v620_v6  ;;  %v637_v6 = vld [vmem:[#allocation4 + $0x6d0] sm:$0xff] }
  0x7b   : > { %701 = vmatpush.msra.mxu0 %v547_v8  ;;  %720 = vmatpush.msra.mxu1 %v615_v9  ;;  %v570_v9 = vld [vmem:[#allocation4 + $0x4b8] sm:$0xff] }
  0x7c   : > { %741 = vmatpush.msra.mxu2 %v548_v10  ;;  %760 = vmatpush.msra.mxu3 %v616_v12  ;;  %v638_v10 = vld [vmem:[#allocation4 + $0x6d8] sm:$0xff] }
  0x7d   : > { %766 = vmatpush.msrb.mxu0 %v609_v13  ;;  %721 = vmatpush.msra.mxu1 %v611_v16  ;;  %v633_v16 = vld [vmem:[#allocation4 + $0x6b0] sm:$0xff] }
  0x7e   : > { %806 = vmatpush.msrb.mxu2 %v610_v14  ;;  %761 = vmatpush.msra.mxu3 %v612_v17 }
  0x7f   : > { %767 = vmatpush.msrb.mxu0 %v605_v18  ;;  %786 = vmatpush.msrb.mxu1 %v673_v19 }
  0x80   : > { %807 = vmatpush.msrb.mxu2 %v606_v20  ;;  %826 = vmatpush.msrb.mxu3 %v674_v21  ;;  %v566_v20 = vld [vmem:[#allocation4 + $0x498] sm:$0xff] }
  0x81   : > { %768 = vmatpush.msrb.mxu0 %v601_v22  ;;  %787 = vmatpush.msrb.mxu1 %v669_v23  ;;  %v634_v21 = vld [vmem:[#allocation4 + $0x6b8] sm:$0xff] }
  0x82   : > { %808 = vmatpush.msrb.mxu2 %v602_v24  ;;  %827 = vmatpush.msrb.mxu3 %v670_v25 }
  0x83   : > { %769 = vmatpush.msrb.mxu0 %v597_v26  ;;  %788 = vmatpush.msrb.mxu1 %v665_v27 }
  0x84   : > { %809 = vmatpush.msrb.mxu2 %v598_v28  ;;  %828 = vmatpush.msrb.mxu3 %v666_v29 }
  0x85   : > { %770 = vmatpush.msrb.mxu0 %v593_v31  ;;  %789 = vmatpush.msrb.mxu1 %v661_v32  ;;  %v629_v31 = vld [vmem:[#allocation4 + $0x690] sm:$0xff]  ;;  %v562_v32 = vld [vmem:[#allocation4 + $0x478] sm:$0xff] }
  0x86   : > { %810 = vmatpush.msrb.mxu2 %v594_v33  ;;  %829 = vmatpush.msrb.mxu3 %v662_v36  ;;  %v630_v36 = vld [vmem:[#allocation4 + $0x698] sm:$0xff] }
  0x87   : > { %771 = vmatpush.msrb.mxu0 %v589_v38  ;;  %790 = vmatpush.msrb.mxu1 %v657_v39 }
  0x88   : > { %811 = vmatpush.msrb.mxu2 %v590_v41  ;;  %830 = vmatpush.msrb.mxu3 %v658_v42  ;;  %v557_v41 = vld [vmem:[#allocation4 + $0x450] sm:$0xff] }
  0x89   : > { %772 = vmatpush.msrb.mxu0 %v585_v43  ;;  %791 = vmatpush.msrb.mxu1 %v653_v44  ;;  %v625_v42 = vld [vmem:[#allocation4 + $0x670] sm:$0xff] }
  0x8a   : > { %812 = vmatpush.msrb.mxu2 %v586_v45  ;;  %831 = vmatpush.msrb.mxu3 %v654_v46  ;;  %v558_v45 = vld [vmem:[#allocation4 + $0x458] sm:$0xff] }
  0x8b   : > { %773 = vmatpush.msrb.mxu0 %v581_v47  ;;  %792 = vmatpush.msrb.mxu1 %v649_v48  ;;  %v626_v46 = vld [vmem:[#allocation4 + $0x678] sm:$0xff] }
  0x8c   : > { %832 = vmatpush.msrb.mxu3 %v650_v51 }
  0x8d   : > { %774 = vmatpush.msrb.mxu0 %v577_v52  ;;  %793 = vmatpush.msrb.mxu1 %v645_v53  ;;  %v554_v52 = vld [vmem:[#allocation4 + $0x438] sm:$0xff] }
  0x8e   : > { %v622_v53 = vld [vmem:[#allocation4 + $0x658] sm:$0xff] }
  0x8f   : > { %794 = vmatpush.msrb.mxu1 %v641_v58  ;;  %v618_v58 = vld [vmem:[#allocation4 + $0x638] sm:$0xff] }
  0x91   : > { %795 = vmatpush.msrb.mxu1 %v637_v6 }
  0x93   : > { %796 = vmatpush.msrb.mxu1 %v633_v16 }
  0x95   : > { %797 = vmatpush.msrb.mxu1 %v629_v31 }
  0x97   : > { %798 = vmatpush.msrb.mxu1 %v625_v42 }
  0xc1   : > { %v375_v57 = vpop.f32.mrf.mxu2 }
  0xc2   : > { %v376_v62 = vadd.f32 %v375_v57, %v311_v50  ;;  %v312_v50 = vperm.slane %v1139_v40, 2  ;;  %v573_v57 = vld [vmem:[#allocation4 + $0x4d0] sm:$0xff] }
  0xc3   : > { %v335_v56 = vpop.f32.mrf.mxu0  ;;  %v395_v0 = vpop.f32.mrf.mxu3  ;;  %775 = vmatpush.msrb.mxu0 %v573_v57  ;;  %v550_v57 = vld [vmem:[#allocation4 + $0x418] sm:$0xff] }
  0xc4   : > { %v336_v61 = vadd.f32 %v335_v56, %v310_v49  ;;  %v396_v5 = vadd.f32 %v395_v0, %v376_v62  ;;  %v582_v49 = vld [vmem:[#allocation4 + $0x518] sm:$0xff] }
  0xc5   : > { %v355_v4 = vpop.f32.mrf.mxu1  ;;  %813 = vmatpush.msrb.mxu2 %v582_v49  ;;  %v646_v56 = vld [vmem:[#allocation4 + $0x718] sm:$0xff]  ;;  %v553_v49 = vld [vmem:[#allocation4 + $0x430] sm:$0xff] }
  0xc6   : > { %v356_v7 = vadd.f32 %v355_v4, %v336_v61  ;;  %v970_v11 = vmul.f32 -1.442695, %v396_v5  ;;  %v574_v0 = vld [vmem:[#allocation4 + $0x4d8] sm:$0xff]  ;;  %833 = vmatpush.msrb.mxu3 %v646_v56  ;;  %v569_v5 = vld [vmem:[#allocation4 + $0x4b0] sm:$0xff] }
  0xc7   : > { %814 = vmatpush.msrb.mxu2 %v578_v54  ;;  %776 = vmatpush.msrb.mxu0 %v569_v5  ;;  %v617_v56 = vld [vmem:[#allocation4 + $0x630] sm:$0xff] }
  0xc8   : > { %v969_v15 = vmul.f32 -1.442695, %v356_v7  ;;  %1001 = vpow2.f32 %v970_v11  ;;  %834 = vmatpush.msrb.mxu3 %v642_v1 }
  0xc9   : > { %815 = vmatpush.msrb.mxu2 %v574_v0 }
  0xca   : > { %1003 = vpow2.f32 %v969_v15  ;;  %v565_v15 = vld [vmem:[#allocation4 + $0x490] sm:$0xff]  ;;  %835 = vmatpush.msrb.mxu3 %v638_v10 }
  0xcb   : > { %816 = vmatpush.msrb.mxu2 %v570_v9  ;;  %777 = vmatpush.msrb.mxu0 %v565_v15 }
  0xcc   : > { %836 = vmatpush.msrb.mxu3 %v634_v21 }
  0xcd   : > { %817 = vmatpush.msrb.mxu2 %v566_v20 }
  0xce   : > { %v1002_v30 = vpop.eup %1001  ;;  %837 = vmatpush.msrb.mxu3 %v630_v36 }
  0xcf   : > { %v1143_v35 = vadd.f32 1.0, %v1002_v30  ;;  %v561_v30 = vld [vmem:[#allocation4 + $0x470] sm:$0xff]  ;;  %818 = vmatpush.msrb.mxu2 %v562_v32 }
  0xd0   : > { %v1004_v34 = vpop.eup %1003  ;;  %778 = vmatpush.msrb.mxu0 %v561_v30  ;;  %838 = vmatpush.msrb.mxu3 %v626_v46 }
  0xd1   : > { %v1145_v37 = vadd.f32 1.0, %v1004_v34  ;;  %1005 = vrcp.f32 %v1143_v35  ;;  %vm506_vm0 = vweird.f32 %v1143_v35  ;;  %v512_v61 = vand.u32 2147483648, %v1143_v35  ;;  %819 = vmatpush.msrb.mxu2 %v558_v45 }
  0xd2   : > { %v510_v4 = vand.u32 2147483647, %v1143_v35  ;;  %779 = vmatpush.msrb.mxu0 %v557_v41  ;;  %839 = vmatpush.msrb.mxu3 %v622_v53 }
  0xd3   : > { %1007 = vrcp.f32 %v1145_v37  ;;  %vm487_vm2 = vweird.f32 %v1145_v37  ;;  %v493_v40 = vand.u32 2147483648, %v1145_v37  ;;  %v491_v13 = vand.u32 2147483647, %v1145_v37  ;;  %820 = vmatpush.msrb.mxu2 %v554_v52 }
  0xd4   : > { %v513_v22 = vor.u32 1.1754944e-38, %v512_v61  ;;  %vm1186_vm6 = vcmp.eq.f32.partialorder %v510_v4, 8.507059e+37  ;;  %780 = vmatpush.msrb.mxu0 %v553_v49  ;;  %v614_v61 = vld [vmem:[#allocation4 + $0x618] sm:$0xff]  ;;  %840 = vmatpush.msrb.mxu3 %v618_v58 }
  0xd5   : > { %v494_v26 = vor.u32 1.1754944e-38, %v493_v40  ;;  %vm1191_vm7 = vcmp.eq.f32.partialorder %v491_v13, 8.507059e+37  ;;  %821 = vmatpush.msrb.mxu2 %v550_v57 }
  0xd6   : > { %841 = vmatpush.msrb.mxu3 %v614_v61  ;;  %v905_v61 = vld [vmem:[#allocation3] sm:$0xff] }
  0xd7   : > { %v1150_v55 = vpop.eup %1005 }
  0xd8   : > { %v502_v60 = vmul.f32 %v1150_v55, %v1143_v35  ;;  %vm507_vm1 = vweird.f32 %v1150_v55  ;;  %v536_v35 = vld [vmem:[#allocation3 + $0x8] sm:$0xff] }
  0xd9   : > { %v1152_v59 = vpop.eup %1007  ;;  %v415_v62 = vpop.f32.mrf.mxu0  ;;  %vm1172_vm4 = vmor %vm506_vm0, %vm507_vm1 }
  0xda   : > { %v483_v2 = vmul.f32 %v1152_v59, %v1145_v37  ;;  %v416_v3 = vadd.f32 %v415_v62, %v312_v50  ;;  %v503_v7 = vsub.f32 1.0, %v502_v60  ;;  %vm488_vm3 = vweird.f32 %v1152_v59  ;;  %v545_v37 = vld [vmem:[#allocation2 + $0x8] sm:$0xff]  ;;  %v621_v50 = vld [vmem:[#allocation4 + $0x650] sm:$0xff] }
  0xdb   : > { %v435_v8 = vpop.f32.mrf.mxu1  ;;  %vm1181_vm5 = vmor %vm487_vm2, %vm488_vm3  ;;  %722 = vmatmul.f32.vlgmr.msra.gmra.mxu1 %v545_v37  ;;  %762 = vmatmul.f32.vlgmr.msra.gmra.mxu3 %v545_v37  ;;  %v613_v60 = vld [vmem:[#allocation4 + $0x610] sm:$0xff] }
  0xdc   : > { %v484_v11 = vsub.f32 1.0, %v483_v2  ;;  %v436_v12 = vadd.f32 %v435_v8, %v416_v3  ;;  %v504_v17 = vmul.f32 %v1150_v55, %v503_v7  ;;  %799 = vmatpush.msrb.mxu1 %v621_v50 }
  0xdd   : > { %v455_v14 = vpop.f32.mrf.mxu2 }
  0xde   : > { %v456_v19 = vadd.f32 %v455_v14, %v313_v63  ;;  %v485_v23 = vmul.f32 %v1152_v59, %v484_v11  ;;  %1009 = vtanh.f32 %v436_v12  ;;  %v505_v27 = vadd.f32 %v1150_v55, %v504_v17  ;;  %800 = vmatpush.msrb.mxu1 %v617_v56  ;;  %v972_v11 = vld [vmem:[%s1220_s2 + $0x4] sm:$0xf] }
  0xdf   : > { %v475_v25 = vpop.f32.mrf.mxu3  ;;  %v678_v12 = vperm.slane %v972_v11, 0  ;;  %v679_v17 = vperm.slane %v972_v11, 1  ;;  %v681_v24 = vperm.slane %v972_v11, 3  ;;  %v680_v34 = vperm.slane %v972_v11, 2 }
  0xe0   : > { %v476_v29 = vadd.f32 %v475_v25, %v456_v19  ;;  %v486_v33 = vadd.f32 %v1152_v59, %v485_v23  ;;  %v509_v38 = vsel %vm1172_vm4, %v1150_v55, %v505_v27  ;;  %v549_v55 = vld [vmem:[#allocation4 + $0x410] sm:$0xff]  ;;  %801 = vmatpush.msrb.mxu1 %v613_v60 }
  0xe1   : > { %v514_v44 = vsel %vm1186_vm6, %v513_v22, %v509_v38  ;;  %781 = vmatpush.msrb.mxu0 %v549_v55 }
  0xe2   : > { %v971_v39 = vmul.f32 -1.442695, %v476_v29  ;;  %v490_v43 = vsel %vm1181_vm5, %v1152_v59, %v486_v33  ;;  %v537_v48 = vmul.f32 %v536_v35, %v514_v44 }
  0xe3   : > { %v495_v47 = vsel %vm1191_vm7, %v494_v26, %v490_v43  ;;  %802 = vmatmul.f32.vlgmr.msrb.gmra.mxu1 %v545_v37  ;;  %842 = vmatmul.f32.vlgmr.msrb.gmra.mxu3 %v545_v37 }
  0xe4   : > { %1011 = vpow2.f32 %v971_v39  ;;  %v1010_v51 = vpop.eup %1009 }
  0xe5   : > { %v538_v54 = vmul.f32 %v1010_v51, %v495_v47 }
  0xe7   : > { %v539_v59 = vadd.f32 %v538_v54, %v537_v48 }
  0xe9   : > { %542 = vst [vmem:[#allocation3 + $0x8] sm:$0xff] %v539_v59 }
  0xea   : > { %v1012_v62 = vpop.eup %1011 }
  0xeb   : > { %v520_v63 = vadd.f32 1.0, %v1012_v62 }
  0xed   : > { %1013 = vrcp.f32 %v520_v63  ;;  %v532_v3 = vand.u32 2147483648, %v520_v63  ;;  %v530_v5 = vand.u32 2147483647, %v520_v63  ;;  %vm526_vm9 = vweird.f32 %v520_v63 }
  0xee   : > { %1015 = vtanh.f32 %v539_v59 }
  0xef   : > { %v533_v7 = vor.u32 1.1754944e-38, %v532_v3  ;;  %vm531_vm11 = vcmp.eq.f32.partialorder %v530_v5, 8.507059e+37 }
  0xf3   : > { %v1014_v0 = vpop.eup %1013 }
  0xf4   : > { %v522_v1 = vmul.f32 %v1014_v0, %v520_v63  ;;  %vm527_vm8 = vweird.f32 %v1014_v0  ;;  %v1016_v40 = vpop.eup %1015 }
  0xf5   : > { %vm528_vm10 = vmor %vm526_vm9, %vm527_vm8 }
  0xf6   : > { %v523_v2 = vsub.f32 1.0, %v522_v1 }
  0xf8   : > { %v524_v4 = vmul.f32 %v1014_v0, %v523_v2 }
  0xfa   : > { %v525_v6 = vadd.f32 %v1014_v0, %v524_v4 }
  0xfc   : > { %v529_v8 = vsel %vm528_vm10, %v1014_v0, %v525_v6 }
  0xfd   : > { %v534_v9 = vsel %vm531_vm11, %v533_v7, %v529_v8 }
  0xfe   : > { %v541_v10 = vmul.f32 %v1016_v40, %v534_v9 }
 0x100   : > { %543 = vst [vmem:[#allocation2] sm:$0xff] %v541_v10  ;;  %702 = vmatmul.f32.vlgmr.msra.gmra.mxu0 %v541_v10  ;;  %742 = vmatmul.f32.vlgmr.msra.gmra.mxu2 %v541_v10 }
 0x108   : > { %782 = vmatmul.f32.vlgmr.msrb.gmra.mxu0 %v541_v10  ;;  %822 = vmatmul.f32.vlgmr.msrb.gmra.mxu2 %v541_v10 }
 0x158   : > { %v723_v14 = vpop.f32.mrf.mxu1 }
 0x15e   : > { %v763_v18 = vpop.f32.mrf.mxu3 }
 0x160   : > { %v803_v41 = vpop.f32.mrf.mxu1 }
 0x166   : > { %v843_v28 = vpop.f32.mrf.mxu3 }
 0x17d   : > { %v703_v13 = vpop.f32.mrf.mxu0 }
 0x17e   : > { %v704_v15 = vadd.f32 %v703_v13, %v678_v12 }
 0x180   : > { %v724_v16 = vadd.f32 %v723_v14, %v704_v15 }
 0x182   : > { %v973_v19 = vmul.f32 -1.442695, %v724_v16 }
 0x183   : > { %v743_v20 = vpop.f32.mrf.mxu2 }
 0x184   : > { %1017 = vpow2.f32 %v973_v19  ;;  %v744_v21 = vadd.f32 %v743_v20, %v679_v17 }
 0x185   : > { %v783_v35 = vpop.f32.mrf.mxu0 }
 0x186   : > { %v764_v22 = vadd.f32 %v763_v18, %v744_v21  ;;  %v784_v38 = vadd.f32 %v783_v35, %v680_v34 }
 0x188   : > { %v974_v23 = vmul.f32 -1.442695, %v764_v22  ;;  %v804_v45 = vadd.f32 %v803_v41, %v784_v38 }
 0x18a   : > { %v1018_v25 = vpop.eup %1017  ;;  %1019 = vpow2.f32 %v974_v23 }
 0x18b   : > { %v849_v26 = vadd.f32 1.0, %v1018_v25  ;;  %v823_v27 = vpop.f32.mrf.mxu2 }
 0x18c   : > { %v824_v29 = vadd.f32 %v823_v27, %v681_v24 }
 0x18d   : > { %1021 = vrcp.f32 %v849_v26  ;;  %v861_v49 = vand.u32 2147483648, %v849_v26  ;;  %vm855_vm13 = vweird.f32 %v849_v26  ;;  %v859_v51 = vand.u32 2147483647, %v849_v26 }
 0x18e   : > { %v844_v30 = vadd.f32 %v843_v28, %v824_v29 }
 0x18f   : > { %v862_v56 = vor.u32 1.1754944e-38, %v861_v49  ;;  %vm860_vm1 = vcmp.eq.f32.partialorder %v859_v51, 8.507059e+37 }
 0x190   : > { %v1020_v31 = vpop.eup %1019  ;;  %v975_v32 = vmul.f32 -1.442695, %v844_v30 }
 0x191   : > { %v868_v33 = vadd.f32 1.0, %v1020_v31 }
 0x192   : > { %1023 = vpow2.f32 %v975_v32 }
 0x193   : > { %v1022_v36 = vpop.eup %1021  ;;  %1025 = vrcp.f32 %v868_v33  ;;  %v880_v52 = vand.u32 2147483648, %v868_v33  ;;  %v878_v55 = vand.u32 2147483647, %v868_v33  ;;  %vm874_vm0 = vweird.f32 %v868_v33 }
 0x194   : > { %v851_v37 = vmul.f32 %v1022_v36, %v849_v26  ;;  %vm856_vm12 = vweird.f32 %v1022_v36 }
 0x195   : > { %vm857_vm14 = vmor %vm855_vm13, %vm856_vm12  ;;  %v881_v59 = vor.u32 1.1754944e-38, %v880_v52  ;;  %vm879_vm3 = vcmp.eq.f32.partialorder %v878_v55, 8.507059e+37 }
 0x196   : > { %v852_v39 = vsub.f32 1.0, %v851_v37 }
 0x198   : > { %v1024_v42 = vpop.eup %1023  ;;  %v853_v43 = vmul.f32 %v1022_v36, %v852_v39 }
 0x199   : > { %v1026_v44 = vpop.eup %1025  ;;  %v888_v46 = vadd.f32 1.0, %v1024_v42 }
 0x19a   : > { %v870_v47 = vmul.f32 %v1026_v44, %v868_v33  ;;  %v854_v48 = vadd.f32 %v1022_v36, %v853_v43  ;;  %vm875_vm15 = vweird.f32 %v1026_v44 }
 0x19b   : > { %1027 = vrcp.f32 %v888_v46  ;;  %vm876_vm2 = vmor %vm874_vm0, %vm875_vm15  ;;  %v900_v8 = vand.u32 2147483648, %v888_v46  ;;  %vm894_vm5 = vweird.f32 %v888_v46  ;;  %v898_v40 = vand.u32 2147483647, %v888_v46 }
 0x19c   : > { %v871_v50 = vsub.f32 1.0, %v870_v47  ;;  %1029 = vtanh.f32 %v804_v45  ;;  %v858_v54 = vsel %vm857_vm14, %v1022_v36, %v854_v48 }
 0x19d   : > { %v863_v60 = vsel %vm860_vm1, %v862_v56, %v858_v54  ;;  %v901_v10 = vor.u32 1.1754944e-38, %v900_v8  ;;  %vm899_vm7 = vcmp.eq.f32.partialorder %v898_v40, 8.507059e+37 }
 0x19e   : > { %v872_v53 = vmul.f32 %v1026_v44, %v871_v50 }
 0x1a0   : > { %v873_v57 = vadd.f32 %v1026_v44, %v872_v53 }
 0x1a1   : > { %v1028_v58 = vpop.eup %1027 }
 0x1a2   : > { %v877_v62 = vsel %vm876_vm2, %v1026_v44, %v873_v57  ;;  %v890_v63 = vmul.f32 %v1028_v58, %v888_v46  ;;  %v1030_v0 = vpop.eup %1029  ;;  %vm895_vm4 = vweird.f32 %v1028_v58 }
 0x1a3   : > { %v882_v1 = vsel %vm879_vm3, %v881_v59, %v877_v62  ;;  %v907_v3 = vmul.f32 %v1030_v0, %v863_v60  ;;  %vm896_vm6 = vmor %vm894_vm5, %vm895_vm4 }
 0x1a4   : > { %v906_v2 = vmul.f32 %v905_v61, %v882_v1  ;;  %v891_v4 = vsub.f32 1.0, %v890_v63 }
 0x1a6   : > { %v908_v5 = vadd.f32 %v907_v3, %v906_v2  ;;  %v892_v6 = vmul.f32 %v1028_v58, %v891_v4 }
 0x1a8   : > { %1031 = vtanh.f32 %v908_v5  ;;  %911 = vst [vmem:[#allocation3] sm:$0xff] %v908_v5  ;;  %v893_v7 = vadd.f32 %v1028_v58, %v892_v6 }
 0x1aa   : > { %v897_v9 = vsel %vm896_vm6, %v1028_v58, %v893_v7 }
 0x1ab   : > { %v902_v12 = vsel %vm899_vm7, %v901_v10, %v897_v9 }
 0x1ad   : > { %916 = sbr.rel (%p976_p8) target bundleno = 437 (0x1b5), region = 44 }
 0x1ae   : > { %v1032_v11 = vpop.eup %1031 }
 0x1af   : > { %v910_v13 = vmul.f32 %v1032_v11, %v902_v12 }
 0x1b1   : > { %912 = vst [vmem:[#allocation2 + $0x8] sm:$0xff] %v910_v13 }
 0x1b2   : > { %v917_v14 = vld [vmem:[#allocation3 + $0x8] sm:$0xff]  ;;  %v918_v15 = vld [vmem:[#allocation3] sm:$0xff] }
 0x1b3   : > { %919 = vst [vmem:[%s1221_s3] sm:$0xff] %v917_v14 }
 0x1b4   : > { %920 = vst [vmem:[%s1221_s3 + $0x8] sm:$0xff] %v918_v15 }
 0x1b5 PF: > { %s14_s12 = sadd.s32 1, %s1073_s12  }
 0x1b6   : > { %p11_p9 = scmp.ge.s32.totalorder %s14_s12, 10  }
 0x1b8   :  { %13 = sbr.rel (!%p11_p9) target bundleno = 1 (0x1), region = 75 }
 0x1bd   :  { %932 = vsyncpa [#allocation5], 1 }
 0x1be   :  { %934 = vsyncpa [#allocation5 + $0x1], 1 }

</bundles_post_ra>
